<compile_context>
chip_gen: v5e
topology: v5e:2x2
jax: 0.10.0
libtpu: 0.0.40
codegen_flags: <defaults>
</compile_context>

<pallas_src>
import jax
import jax.numpy as jnp
from jax.experimental import pallas as pl
from jax.experimental.pallas import tpu as pltpu


def _transition_kernel(x_ref, scale_ref, shift_ref, w_ref, o_ref, p_scratch):
    # x_ref:     (1, TH, W, Cin)   f32   input row-tile of one batch element
    # scale_ref: (1, Cin)          f32   fused BN scale = gamma / sqrt(var + eps)
    # shift_ref: (1, Cin)          f32   fused BN shift = beta - mean * scale
    # w_ref:     (Cin, Cout_p)     bf16  1x1-conv weight * 0.25 (pool folded in)
    # o_ref:     (1, TH//2, W//2, Cout_p)  pooled + convolved output row-tile
    # p_scratch: (TH//2, W//2, Cin) pool-dtype  pooled activations (pre-conv)
    _, TH, W, Cin = x_ref.shape
    Ho = TH // 2
    Wo = W // 2
    Cout_p = w_ref.shape[1]

    # Hoist the per-channel BN broadcast out of the row loop (no per-iter
    # broadcast_in_dim re-emission).
    scale = jnp.broadcast_to(scale_ref[...].reshape(1, 1, Cin), (2, W, Cin))
    shift = jnp.broadcast_to(shift_ref[...].reshape(1, 1, Cin), (2, W, Cin))

    def row_pair(r, carry):
        # Two adjacent input rows -> one pooled output row.  Live ranges stay
        # O(2 rows) instead of O(full tile), so no f32 full-tile intermediates.
        start = pl.multiple_of(2 * r, 2)
        xp = x_ref[0, pl.ds(start, 2)]                       # (2, W, Cin) f32
        a = jnp.maximum(xp * scale + shift, 0.0)             # BN + ReLU (f32 VPU)
        a = a.astype(p_scratch.dtype)                        # bf16 on v6e/v7x
        h = a[0] + a[1]                                       # height pool (W, Cin)
        p = h.reshape(Wo, 2, Cin).sum(axis=1)                 # width pool  (Wo, Cin)
        p_scratch[r] = p
        return carry

    jax.lax.fori_loop(0, Ho, row_pair, 0, unroll=True)

    # 1x1 conv == per-pixel matmul over channels on the MXU; bf16 in, f32 acc.
    p2 = p_scratch[...].reshape(Ho * Wo, Cin).astype(jnp.bfloat16)
    y = jnp.dot(p2, w_ref[...], preferred_element_type=jnp.float32)
    o_ref[...] = y.reshape(1, Ho, Wo, Cout_p).astype(o_ref.dtype)


def _pool_compute_dtype():
    """bf16 elementwise only on chips with a native bf16 VPU (v6e / v7x)."""
    try:
        kind = jax.devices()[0].device_kind.lower()
    except Exception:
        return jnp.float32
    if "v6" in kind or "v7" in kind or "7x" in kind:
        return jnp.bfloat16
    return jnp.float32  # v5e / older: no bf16 VPU datapath -> keep f32


def _pick_row_tile(H, W, Cin, N, itemsize=4, block_budget_bytes=4 << 20):
    """Largest even divisor of H whose f32 input block fits the per-buffer
    budget, while keeping >= 2 total grid steps (both v7x TensorCores busy)."""
    row_bytes = W * Cin * itemsize
    best = 2
    for th in range(2, H + 1, 2):
        if H % th == 0 and th * row_bytes <= block_budget_bytes:
            best = th
    if N * (H // best) < 2:           # single-step grid would idle one v7x core
        th = best
        while th > 2:
            th -= 2
            if H % th == 0:
                best = th
                break
    return best


def transition_forward_nhwc(x, gamma, beta, running_mean, running_var, conv_w,
                            eps=1e-5, row_tile=None, out_dtype=None,
                            pool_dtype=None):
    """NHWC-native Pallas implementation of _Transition.forward (inference BN).

    x      : (N, H, W, Cin) float32
    conv_w : (Cout, Cin, 1, 1)   (PyTorch weight layout)
    returns: (N, H//2, W//2, Cout)
    """
    N, H, W, Cin = x.shape
    Cout = conv_w.shape[0]
    assert H % 2 == 0 and W % 2 == 0, "even spatial dims expected"
    out_dtype = x.dtype if out_dtype is None else out_dtype
    pool_dtype = _pool_compute_dtype() if pool_dtype is None else pool_dtype

    # Fold BN running stats into per-channel scale/shift (inference form).
    scale_v = (gamma / jnp.sqrt(running_var + eps)).astype(jnp.float32)
    shift_v = (beta - running_mean * scale_v).astype(jnp.float32)
    scale = scale_v.reshape(1, Cin)
    shift = shift_v.reshape(1, Cin)

    # 1x1-conv weight -> (Cin, Cout); fold the 2x2 avg-pool 1/4 factor.
    w = jnp.transpose(conv_w.reshape(Cout, Cin), (1, 0)) * 0.25
    # Lane-pad Cout only when large and misaligned; the common DenseNet Cout
    # (128/256/512) needs no padding and no wrapper slice, and small Cout is
    # better left unpadded than inflating HBM writes.
    if Cout % 128 == 0 or Cout < 128:
        Cout_p = Cout
    else:
        Cout_p = ((Cout + 127) // 128) * 128
        w = jnp.pad(w, ((0, 0), (0, Cout_p - Cout)))
    w = w.astype(jnp.bfloat16)

    TH = _pick_row_tile(H, W, Cin, N) if row_tile is None else row_tile
    assert H % TH == 0 and TH % 2 == 0
    Ho, Wo = TH // 2, W // 2

    # Advisory cost estimate (helps XLA schedule neighbouring ops).
    m_total = N * (H // 2) * (W // 2)
    out_isz = jnp.dtype(out_dtype).itemsize
    flops = 2 * m_total * Cin * Cout_p + 6 * N * H * W * Cin
    bytes_accessed = (N * H * W * Cin * x.dtype.itemsize
                      + m_total * Cout_p * out_isz
                      + w.size * 2 + 2 * Cin * 4)

    # Explicit VMEM budget sized from the actual blocks (v7x has 64 MiB).
    in_block = TH * W * Cin * x.dtype.itemsize
    out_block = Ho * Wo * Cout_p * out_isz
    scratch_b = Ho * Wo * Cin * jnp.dtype(pool_dtype).itemsize
    vmem_est = 2 * in_block + 2 * out_block + scratch_b + 2 * w.size * 2 + (2 << 20)
    vmem_limit = int(min(48 << 20, max(16 << 20, vmem_est)))

    out = pl.pallas_call(
        _transition_kernel,
        out_shape=jax.ShapeDtypeStruct((N, H // 2, W // 2, Cout_p), out_dtype),
        grid_spec=pltpu.PrefetchScalarGridSpec(
            num_scalar_prefetch=0,
            grid=(N, H // TH),
            in_specs=[
                pl.BlockSpec((1, TH, W, Cin), lambda n, r: (n, r, 0, 0)),
                pl.BlockSpec((1, Cin), lambda n, r: (0, 0)),
                pl.BlockSpec((1, Cin), lambda n, r: (0, 0)),
                pl.BlockSpec((Cin, Cout_p), lambda n, r: (0, 0)),
            ],
            out_specs=pl.BlockSpec((1, Ho, Wo, Cout_p),
                                   lambda n, r: (n, r, 0, 0)),
            scratch_shapes=[pltpu.VMEM((Ho, Wo, Cin), pool_dtype)],
        ),
        compiler_params=pltpu.CompilerParams(
            dimension_semantics=("parallel", "parallel"),
            vmem_limit_bytes=vmem_limit),
        cost_estimate=pl.CostEstimate(flops=flops, transcendentals=0,
                                      bytes_accessed=bytes_accessed),
    )(x, scale, shift, w)

    return out if Cout_p == Cout else out[..., :Cout]


def transition_forward(x_nchw, gamma, beta, running_mean, running_var, conv_w,
                       eps=1e-5, **kw):
    """PyTorch-layout (NCHW) compatibility wrapper around the NHWC kernel.

    The two transposes below exist only to match the PyTorch interface for
    parity testing; a model kept NHWC end-to-end should call
    `transition_forward_nhwc` directly and avoid both HBM round-trips.
    """
    x = jnp.transpose(x_nchw, (0, 2, 3, 1))
    y = transition_forward_nhwc(x, gamma, beta, running_mean, running_var,
                                conv_w, eps=eps, **kw)
    return jnp.transpose(y, (0, 3, 1, 2))


def _reference(x, gamma, beta, mean, var, conv_w, eps=1e-5):
    # Plain-JAX f32 reference of the PyTorch forward (BN -> ReLU -> conv -> pool).
    xn = (x - mean[None, :, None, None]) / jnp.sqrt(var + eps)[None, :, None, None]
    xn = xn * gamma[None, :, None, None] + beta[None, :, None, None]
    a = jnp.maximum(xn, 0.0)
    y = jnp.einsum("nchw,oc->nohw", a, conv_w[:, :, 0, 0])
    N, Co, H, W = y.shape
    return y.reshape(N, Co, H // 2, 2, W // 2, 2).mean(axis=(3, 5))


if __name__ == "__main__":
    # Small shapes consistent with the module: NCHW input, in=8, out=4 channels.
    N, Cin, Cout, H, W = 2, 8, 4, 16, 16

    key = jax.random.PRNGKey(0)
    kx, kg, kb, km, kv, kw = jax.random.split(key, 6)

    x = jax.random.normal(kx, (N, Cin, H, W), dtype=jnp.float32)

    # Deterministic synthetic parameters (BatchNorm2d + 1x1 Conv2d, no bias).
    gamma = 1.0 + 0.1 * jax.random.normal(kg, (Cin,), dtype=jnp.float32)
    beta = 0.1 * jax.random.normal(kb, (Cin,), dtype=jnp.float32)
    running_mean = 0.1 * jax.random.normal(km, (Cin,), dtype=jnp.float32)
    running_var = jnp.abs(jax.random.normal(kv, (Cin,), dtype=jnp.float32)) + 0.5
    conv_w = 0.1 * jax.random.normal(kw, (Cout, Cin, 1, 1), dtype=jnp.float32)

    out = transition_forward(x, gamma, beta, running_mean, running_var, conv_w)
    out = jax.block_until_ready(out)

    ref = _reference(x, gamma, beta, running_mean, running_var, conv_w)
    assert out.shape == (N, Cout, H // 2, W // 2)
    # bf16 MXU operands (f32 accumulation) -> relaxed tolerance vs the f32 ref.
    assert jnp.allclose(out, ref, atol=2e-2, rtol=2e-2), \
        float(jnp.max(jnp.abs(out - ref)))

    print("KERNEL_OK")
</pallas_src>

<mosaic_0001>
module attributes {stable_mosaic.version = 11 : i64} {
  func.func @_transition_kernel(%arg0: i32, %arg1: i32, %arg2: memref<1x16x16x8xf32, #tpu.memory_space<vmem>>, %arg3: memref<1x8xf32, #tpu.memory_space<vmem>>, %arg4: memref<1x8xf32, #tpu.memory_space<vmem>>, %arg5: memref<8x4xbf16, #tpu.memory_space<vmem>>, %arg6: memref<1x8x8x4xf32, #tpu.memory_space<vmem>>, %arg7: memref<8x8x8xf32, #tpu.memory_space<vmem>>) attributes {dimension_semantics = [#tpu.dimension_semantics<parallel>, #tpu.dimension_semantics<parallel>], iteration_bounds = array<i64: 2, 1>, scalar_prefetch = 0 : i64, scratch_operands = 1 : i64, tpu.core_type = #tpu.core_type<tc>, window_params = [{transform_indices = @transform_0, window_bounds = array<i64: 1, 16, 16, 8>}, {pipeline_mode = #tpu.pipeline_mode<synchronous>, transform_indices = @transform_1, window_bounds = array<i64: 1, 8>}, {pipeline_mode = #tpu.pipeline_mode<synchronous>, transform_indices = @transform_2, window_bounds = array<i64: 1, 8>}, {pipeline_mode = #tpu.pipeline_mode<synchronous>, transform_indices = @transform_3, window_bounds = array<i64: 8, 4>}, {transform_indices = @transform_4, window_bounds = array<i64: 1, 8, 8, 4>}]} {
    %c0 = arith.constant 0 : index
    %c0_0 = arith.constant 0 : index
    %0 = vector.load %arg3[%c0, %c0_0] : memref<1x8xf32, #tpu.memory_space<vmem>>, vector<1x8xf32>
    %1 = vector.shape_cast %0 : vector<1x8xf32> to vector<1x1x8xf32>
    %2 = vector.shape_cast %1 : vector<1x1x8xf32> to vector<1x1x8xf32>
    %3 = vector.broadcast %2 : vector<1x1x8xf32> to vector<2x16x8xf32>
    %c0_1 = arith.constant 0 : index
    %c0_2 = arith.constant 0 : index
    %4 = vector.load %arg4[%c0_1, %c0_2] : memref<1x8xf32, #tpu.memory_space<vmem>>, vector<1x8xf32>
    %5 = vector.shape_cast %4 : vector<1x8xf32> to vector<1x1x8xf32>
    %6 = vector.shape_cast %5 : vector<1x1x8xf32> to vector<1x1x8xf32>
    %7 = vector.broadcast %6 : vector<1x1x8xf32> to vector<2x16x8xf32>
    %c0_i32 = arith.constant 0 : i32
    %c2_i32 = arith.constant 2 : i32
    %8 = arith.muli %c2_i32, %c0_i32 : i32
    %9 = tpu.assume_multiple %8, 2 : i32
    %c0_3 = arith.constant 0 : index
    %10 = arith.index_cast %9 : i32 to index
    %c0_4 = arith.constant 0 : index
    %c0_5 = arith.constant 0 : index
    %11 = vector.load %arg2[%c0_3, %10, %c0_4, %c0_5] : memref<1x16x16x8xf32, #tpu.memory_space<vmem>>, vector<1x2x16x8xf32>
    %12 = vector.shape_cast %11 : vector<1x2x16x8xf32> to vector<2x16x8xf32>
    %13 = arith.mulf %12, %3 : vector<2x16x8xf32>
    %14 = arith.addf %13, %7 : vector<2x16x8xf32>
    %cst = arith.constant 0.000000e+00 : f32
    %15 = vector.broadcast %cst : f32 to vector<2x16x8xf32>
    %16 = arith.maximumf %14, %15 : vector<2x16x8xf32>
    %17 = vector.extract_strided_slice %16 {offsets = [0, 0, 0], sizes = [1, 16, 8], strides = [1, 1, 1]} : vector<2x16x8xf32> to vector<1x16x8xf32>
    %18 = vector.shape_cast %17 : vector<1x16x8xf32> to vector<16x8xf32>
    %19 = vector.extract_strided_slice %16 {offsets = [1, 0, 0], sizes = [1, 16, 8], strides = [1, 1, 1]} : vector<2x16x8xf32> to vector<1x16x8xf32>
    %20 = vector.shape_cast %19 : vector<1x16x8xf32> to vector<16x8xf32>
    %21 = arith.addf %18, %20 : vector<16x8xf32>
    %22 = vector.shape_cast %21 : vector<16x8xf32> to vector<8x2x8xf32>
    %cst_6 = arith.constant dense<0.000000e+00> : vector<8x8xf32>
    %23 = vector.multi_reduction <add>, %22, %cst_6 [1] : vector<8x2x8xf32> to vector<8x8xf32>
    %24 = arith.index_cast %c0_i32 : i32 to index
    %c0_7 = arith.constant 0 : index
    %c0_8 = arith.constant 0 : index
    %25 = vector.load %arg7[%24, %c0_7, %c0_8] : memref<8x8x8xf32, #tpu.memory_space<vmem>>, vector<1x8x8xf32>
    %26 = vector.shape_cast %25 : vector<1x8x8xf32> to vector<8x8xf32>
    %27 = vector.shape_cast %23 : vector<8x8xf32> to vector<1x8x8xf32>
    tpu.vector_store %arg7[%24, %c0_7, %c0_8], %27 {strides = array<i32>} : memref<8x8x8xf32, #tpu.memory_space<vmem>>, vector<1x8x8xf32>,
    %c1_i32 = arith.constant 1 : i32
    %c2_i32_9 = arith.constant 2 : i32
    %28 = arith.muli %c2_i32_9, %c1_i32 : i32
    %29 = tpu.assume_multiple %28, 2 : i32
    %c0_10 = arith.constant 0 : index
    %30 = arith.index_cast %29 : i32 to index
    %c0_11 = arith.constant 0 : index
    %c0_12 = arith.constant 0 : index
    %31 = vector.load %arg2[%c0_10, %30, %c0_11, %c0_12] : memref<1x16x16x8xf32, #tpu.memory_space<vmem>>, vector<1x2x16x8xf32>
    %32 = vector.shape_cast %31 : vector<1x2x16x8xf32> to vector<2x16x8xf32>
    %33 = arith.mulf %32, %3 : vector<2x16x8xf32>
    %34 = arith.addf %33, %7 : vector<2x16x8xf32>
    %cst_13 = arith.constant 0.000000e+00 : f32
    %35 = vector.broadcast %cst_13 : f32 to vector<2x16x8xf32>
    %36 = arith.maximumf %34, %35 : vector<2x16x8xf32>
    %37 = vector.extract_strided_slice %36 {offsets = [0, 0, 0], sizes = [1, 16, 8], strides = [1, 1, 1]} : vector<2x16x8xf32> to vector<1x16x8xf32>
    %38 = vector.shape_cast %37 : vector<1x16x8xf32> to vector<16x8xf32>
    %39 = vector.extract_strided_slice %36 {offsets = [1, 0, 0], sizes = [1, 16, 8], strides = [1, 1, 1]} : vector<2x16x8xf32> to vector<1x16x8xf32>
    %40 = vector.shape_cast %39 : vector<1x16x8xf32> to vector<16x8xf32>
    %41 = arith.addf %38, %40 : vector<16x8xf32>
    %42 = vector.shape_cast %41 : vector<16x8xf32> to vector<8x2x8xf32>
    %cst_14 = arith.constant dense<0.000000e+00> : vector<8x8xf32>
    %43 = vector.multi_reduction <add>, %42, %cst_14 [1] : vector<8x2x8xf32> to vector<8x8xf32>
    %44 = arith.index_cast %c1_i32 : i32 to index
    %c0_15 = arith.constant 0 : index
    %c0_16 = arith.constant 0 : index
    %45 = vector.load %arg7[%44, %c0_15, %c0_16] : memref<8x8x8xf32, #tpu.memory_space<vmem>>, vector<1x8x8xf32>
    %46 = vector.shape_cast %45 : vector<1x8x8xf32> to vector<8x8xf32>
    %47 = vector.shape_cast %43 : vector<8x8xf32> to vector<1x8x8xf32>
    tpu.vector_store %arg7[%44, %c0_15, %c0_16], %47 {strides = array<i32>} : memref<8x8x8xf32, #tpu.memory_space<vmem>>, vector<1x8x8xf32>,
    %c2_i32_17 = arith.constant 2 : i32
    %c2_i32_18 = arith.constant 2 : i32
    %48 = arith.muli %c2_i32_18, %c2_i32_17 : i32
    %49 = tpu.assume_multiple %48, 2 : i32
    %c0_19 = arith.constant 0 : index
    %50 = arith.index_cast %49 : i32 to index
    %c0_20 = arith.constant 0 : index
    %c0_21 = arith.constant 0 : index
    %51 = vector.load %arg2[%c0_19, %50, %c0_20, %c0_21] : memref<1x16x16x8xf32, #tpu.memory_space<vmem>>, vector<1x2x16x8xf32>
    %52 = vector.shape_cast %51 : vector<1x2x16x8xf32> to vector<2x16x8xf32>
    %53 = arith.mulf %52, %3 : vector<2x16x8xf32>
    %54 = arith.addf %53, %7 : vector<2x16x8xf32>
    %cst_22 = arith.constant 0.000000e+00 : f32
    %55 = vector.broadcast %cst_22 : f32 to vector<2x16x8xf32>
    %56 = arith.maximumf %54, %55 : vector<2x16x8xf32>
    %57 = vector.extract_strided_slice %56 {offsets = [0, 0, 0], sizes = [1, 16, 8], strides = [1, 1, 1]} : vector<2x16x8xf32> to vector<1x16x8xf32>
    %58 = vector.shape_cast %57 : vector<1x16x8xf32> to vector<16x8xf32>
    %59 = vector.extract_strided_slice %56 {offsets = [1, 0, 0], sizes = [1, 16, 8], strides = [1, 1, 1]} : vector<2x16x8xf32> to vector<1x16x8xf32>
    %60 = vector.shape_cast %59 : vector<1x16x8xf32> to vector<16x8xf32>
    %61 = arith.addf %58, %60 : vector<16x8xf32>
    %62 = vector.shape_cast %61 : vector<16x8xf32> to vector<8x2x8xf32>
    %cst_23 = arith.constant dense<0.000000e+00> : vector<8x8xf32>
    %63 = vector.multi_reduction <add>, %62, %cst_23 [1] : vector<8x2x8xf32> to vector<8x8xf32>
    %64 = arith.index_cast %c2_i32_17 : i32 to index
    %c0_24 = arith.constant 0 : index
    %c0_25 = arith.constant 0 : index
    %65 = vector.load %arg7[%64, %c0_24, %c0_25] : memref<8x8x8xf32, #tpu.memory_space<vmem>>, vector<1x8x8xf32>
    %66 = vector.shape_cast %65 : vector<1x8x8xf32> to vector<8x8xf32>
    %67 = vector.shape_cast %63 : vector<8x8xf32> to vector<1x8x8xf32>
    tpu.vector_store %arg7[%64, %c0_24, %c0_25], %67 {strides = array<i32>} : memref<8x8x8xf32, #tpu.memory_space<vmem>>, vector<1x8x8xf32>,
    %c3_i32 = arith.constant 3 : i32
    %c2_i32_26 = arith.constant 2 : i32
    %68 = arith.muli %c2_i32_26, %c3_i32 : i32
    %69 = tpu.assume_multiple %68, 2 : i32
    %c0_27 = arith.constant 0 : index
    %70 = arith.index_cast %69 : i32 to index
    %c0_28 = arith.constant 0 : index
    %c0_29 = arith.constant 0 : index
    %71 = vector.load %arg2[%c0_27, %70, %c0_28, %c0_29] : memref<1x16x16x8xf32, #tpu.memory_space<vmem>>, vector<1x2x16x8xf32>
    %72 = vector.shape_cast %71 : vector<1x2x16x8xf32> to vector<2x16x8xf32>
    %73 = arith.mulf %72, %3 : vector<2x16x8xf32>
    %74 = arith.addf %73, %7 : vector<2x16x8xf32>
    %cst_30 = arith.constant 0.000000e+00 : f32
    %75 = vector.broadcast %cst_30 : f32 to vector<2x16x8xf32>
    %76 = arith.maximumf %74, %75 : vector<2x16x8xf32>
    %77 = vector.extract_strided_slice %76 {offsets = [0, 0, 0], sizes = [1, 16, 8], strides = [1, 1, 1]} : vector<2x16x8xf32> to vector<1x16x8xf32>
    %78 = vector.shape_cast %77 : vector<1x16x8xf32> to vector<16x8xf32>
    %79 = vector.extract_strided_slice %76 {offsets = [1, 0, 0], sizes = [1, 16, 8], strides = [1, 1, 1]} : vector<2x16x8xf32> to vector<1x16x8xf32>
    %80 = vector.shape_cast %79 : vector<1x16x8xf32> to vector<16x8xf32>
    %81 = arith.addf %78, %80 : vector<16x8xf32>
    %82 = vector.shape_cast %81 : vector<16x8xf32> to vector<8x2x8xf32>
    %cst_31 = arith.constant dense<0.000000e+00> : vector<8x8xf32>
    %83 = vector.multi_reduction <add>, %82, %cst_31 [1] : vector<8x2x8xf32> to vector<8x8xf32>
    %84 = arith.index_cast %c3_i32 : i32 to index
    %c0_32 = arith.constant 0 : index
    %c0_33 = arith.constant 0 : index
    %85 = vector.load %arg7[%84, %c0_32, %c0_33] : memref<8x8x8xf32, #tpu.memory_space<vmem>>, vector<1x8x8xf32>
    %86 = vector.shape_cast %85 : vector<1x8x8xf32> to vector<8x8xf32>
    %87 = vector.shape_cast %83 : vector<8x8xf32> to vector<1x8x8xf32>
    tpu.vector_store %arg7[%84, %c0_32, %c0_33], %87 {strides = array<i32>} : memref<8x8x8xf32, #tpu.memory_space<vmem>>, vector<1x8x8xf32>,
    %c4_i32 = arith.constant 4 : i32
    %c2_i32_34 = arith.constant 2 : i32
    %88 = arith.muli %c2_i32_34, %c4_i32 : i32
    %89 = tpu.assume_multiple %88, 2 : i32
    %c0_35 = arith.constant 0 : index
    %90 = arith.index_cast %89 : i32 to index
    %c0_36 = arith.constant 0 : index
    %c0_37 = arith.constant 0 : index
    %91 = vector.load %arg2[%c0_35, %90, %c0_36, %c0_37] : memref<1x16x16x8xf32, #tpu.memory_space<vmem>>, vector<1x2x16x8xf32>
    %92 = vector.shape_cast %91 : vector<1x2x16x8xf32> to vector<2x16x8xf32>
    %93 = arith.mulf %92, %3 : vector<2x16x8xf32>
    %94 = arith.addf %93, %7 : vector<2x16x8xf32>
    %cst_38 = arith.constant 0.000000e+00 : f32
    %95 = vector.broadcast %cst_38 : f32 to vector<2x16x8xf32>
    %96 = arith.maximumf %94, %95 : vector<2x16x8xf32>
    %97 = vector.extract_strided_slice %96 {offsets = [0, 0, 0], sizes = [1, 16, 8], strides = [1, 1, 1]} : vector<2x16x8xf32> to vector<1x16x8xf32>
    %98 = vector.shape_cast %97 : vector<1x16x8xf32> to vector<16x8xf32>
    %99 = vector.extract_strided_slice %96 {offsets = [1, 0, 0], sizes = [1, 16, 8], strides = [1, 1, 1]} : vector<2x16x8xf32> to vector<1x16x8xf32>
    %100 = vector.shape_cast %99 : vector<1x16x8xf32> to vector<16x8xf32>
    %101 = arith.addf %98, %100 : vector<16x8xf32>
    %102 = vector.shape_cast %101 : vector<16x8xf32> to vector<8x2x8xf32>
    %cst_39 = arith.constant dense<0.000000e+00> : vector<8x8xf32>
    %103 = vector.multi_reduction <add>, %102, %cst_39 [1] : vector<8x2x8xf32> to vector<8x8xf32>
    %104 = arith.index_cast %c4_i32 : i32 to index
    %c0_40 = arith.constant 0 : index
    %c0_41 = arith.constant 0 : index
    %105 = vector.load %arg7[%104, %c0_40, %c0_41] : memref<8x8x8xf32, #tpu.memory_space<vmem>>, vector<1x8x8xf32>
    %106 = vector.shape_cast %105 : vector<1x8x8xf32> to vector<8x8xf32>
    %107 = vector.shape_cast %103 : vector<8x8xf32> to vector<1x8x8xf32>
    tpu.vector_store %arg7[%104, %c0_40, %c0_41], %107 {strides = array<i32>} : memref<8x8x8xf32, #tpu.memory_space<vmem>>, vector<1x8x8xf32>,
    %c5_i32 = arith.constant 5 : i32
    %c2_i32_42 = arith.constant 2 : i32
    %108 = arith.muli %c2_i32_42, %c5_i32 : i32
    %109 = tpu.assume_multiple %108, 2 : i32
    %c0_43 = arith.constant 0 : index
    %110 = arith.index_cast %109 : i32 to index
    %c0_44 = arith.constant 0 : index
    %c0_45 = arith.constant 0 : index
    %111 = vector.load %arg2[%c0_43, %110, %c0_44, %c0_45] : memref<1x16x16x8xf32, #tpu.memory_space<vmem>>, vector<1x2x16x8xf32>
    %112 = vector.shape_cast %111 : vector<1x2x16x8xf32> to vector<2x16x8xf32>
    %113 = arith.mulf %112, %3 : vector<2x16x8xf32>
    %114 = arith.addf %113, %7 : vector<2x16x8xf32>
    %cst_46 = arith.constant 0.000000e+00 : f32
    %115 = vector.broadcast %cst_46 : f32 to vector<2x16x8xf32>
    %116 = arith.maximumf %114, %115 : vector<2x16x8xf32>
    %117 = vector.extract_strided_slice %116 {offsets = [0, 0, 0], sizes = [1, 16, 8], strides = [1, 1, 1]} : vector<2x16x8xf32> to vector<1x16x8xf32>
    %118 = vector.shape_cast %117 : vector<1x16x8xf32> to vector<16x8xf32>
    %119 = vector.extract_strided_slice %116 {offsets = [1, 0, 0], sizes = [1, 16, 8], strides = [1, 1, 1]} : vector<2x16x8xf32> to vector<1x16x8xf32>
    %120 = vector.shape_cast %119 : vector<1x16x8xf32> to vector<16x8xf32>
    %121 = arith.addf %118, %120 : vector<16x8xf32>
    %122 = vector.shape_cast %121 : vector<16x8xf32> to vector<8x2x8xf32>
    %cst_47 = arith.constant dense<0.000000e+00> : vector<8x8xf32>
    %123 = vector.multi_reduction <add>, %122, %cst_47 [1] : vector<8x2x8xf32> to vector<8x8xf32>
    %124 = arith.index_cast %c5_i32 : i32 to index
    %c0_48 = arith.constant 0 : index
    %c0_49 = arith.constant 0 : index
    %125 = vector.load %arg7[%124, %c0_48, %c0_49] : memref<8x8x8xf32, #tpu.memory_space<vmem>>, vector<1x8x8xf32>
    %126 = vector.shape_cast %125 : vector<1x8x8xf32> to vector<8x8xf32>
    %127 = vector.shape_cast %123 : vector<8x8xf32> to vector<1x8x8xf32>
    tpu.vector_store %arg7[%124, %c0_48, %c0_49], %127 {strides = array<i32>} : memref<8x8x8xf32, #tpu.memory_space<vmem>>, vector<1x8x8xf32>,
    %c6_i32 = arith.constant 6 : i32
    %c2_i32_50 = arith.constant 2 : i32
    %128 = arith.muli %c2_i32_50, %c6_i32 : i32
    %129 = tpu.assume_multiple %128, 2 : i32
    %c0_51 = arith.constant 0 : index
    %130 = arith.index_cast %129 : i32 to index
    %c0_52 = arith.constant 0 : index
    %c0_53 = arith.constant 0 : index
    %131 = vector.load %arg2[%c0_51, %130, %c0_52, %c0_53] : memref<1x16x16x8xf32, #tpu.memory_space<vmem>>, vector<1x2x16x8xf32>
    %132 = vector.shape_cast %131 : vector<1x2x16x8xf32> to vector<2x16x8xf32>
    %133 = arith.mulf %132, %3 : vector<2x16x8xf32>
    %134 = arith.addf %133, %7 : vector<2x16x8xf32>
    %cst_54 = arith.constant 0.000000e+00 : f32
    %135 = vector.broadcast %cst_54 : f32 to vector<2x16x8xf32>
    %136 = arith.maximumf %134, %135 : vector<2x16x8xf32>
    %137 = vector.extract_strided_slice %136 {offsets = [0, 0, 0], sizes = [1, 16, 8], strides = [1, 1, 1]} : vector<2x16x8xf32> to vector<1x16x8xf32>
    %138 = vector.shape_cast %137 : vector<1x16x8xf32> to vector<16x8xf32>
    %139 = vector.extract_strided_slice %136 {offsets = [1, 0, 0], sizes = [1, 16, 8], strides = [1, 1, 1]} : vector<2x16x8xf32> to vector<1x16x8xf32>
    %140 = vector.shape_cast %139 : vector<1x16x8xf32> to vector<16x8xf32>
    %141 = arith.addf %138, %140 : vector<16x8xf32>
    %142 = vector.shape_cast %141 : vector<16x8xf32> to vector<8x2x8xf32>
    %cst_55 = arith.constant dense<0.000000e+00> : vector<8x8xf32>
    %143 = vector.multi_reduction <add>, %142, %cst_55 [1] : vector<8x2x8xf32> to vector<8x8xf32>
    %144 = arith.index_cast %c6_i32 : i32 to index
    %c0_56 = arith.constant 0 : index
    %c0_57 = arith.constant 0 : index
    %145 = vector.load %arg7[%144, %c0_56, %c0_57] : memref<8x8x8xf32, #tpu.memory_space<vmem>>, vector<1x8x8xf32>
    %146 = vector.shape_cast %145 : vector<1x8x8xf32> to vector<8x8xf32>
    %147 = vector.shape_cast %143 : vector<8x8xf32> to vector<1x8x8xf32>
    tpu.vector_store %arg7[%144, %c0_56, %c0_57], %147 {strides = array<i32>} : memref<8x8x8xf32, #tpu.memory_space<vmem>>, vector<1x8x8xf32>,
    %c7_i32 = arith.constant 7 : i32
    %c2_i32_58 = arith.constant 2 : i32
    %148 = arith.muli %c2_i32_58, %c7_i32 : i32
    %149 = tpu.assume_multiple %148, 2 : i32
    %c0_59 = arith.constant 0 : index
    %150 = arith.index_cast %149 : i32 to index
    %c0_60 = arith.constant 0 : index
    %c0_61 = arith.constant 0 : index
    %151 = vector.load %arg2[%c0_59, %150, %c0_60, %c0_61] : memref<1x16x16x8xf32, #tpu.memory_space<vmem>>, vector<1x2x16x8xf32>
    %152 = vector.shape_cast %151 : vector<1x2x16x8xf32> to vector<2x16x8xf32>
    %153 = arith.mulf %152, %3 : vector<2x16x8xf32>
    %154 = arith.addf %153, %7 : vector<2x16x8xf32>
    %cst_62 = arith.constant 0.000000e+00 : f32
    %155 = vector.broadcast %cst_62 : f32 to vector<2x16x8xf32>
    %156 = arith.maximumf %154, %155 : vector<2x16x8xf32>
    %157 = vector.extract_strided_slice %156 {offsets = [0, 0, 0], sizes = [1, 16, 8], strides = [1, 1, 1]} : vector<2x16x8xf32> to vector<1x16x8xf32>
    %158 = vector.shape_cast %157 : vector<1x16x8xf32> to vector<16x8xf32>
    %159 = vector.extract_strided_slice %156 {offsets = [1, 0, 0], sizes = [1, 16, 8], strides = [1, 1, 1]} : vector<2x16x8xf32> to vector<1x16x8xf32>
    %160 = vector.shape_cast %159 : vector<1x16x8xf32> to vector<16x8xf32>
    %161 = arith.addf %158, %160 : vector<16x8xf32>
    %162 = vector.shape_cast %161 : vector<16x8xf32> to vector<8x2x8xf32>
    %cst_63 = arith.constant dense<0.000000e+00> : vector<8x8xf32>
    %163 = vector.multi_reduction <add>, %162, %cst_63 [1] : vector<8x2x8xf32> to vector<8x8xf32>
    %164 = arith.index_cast %c7_i32 : i32 to index
    %c0_64 = arith.constant 0 : index
    %c0_65 = arith.constant 0 : index
    %165 = vector.load %arg7[%164, %c0_64, %c0_65] : memref<8x8x8xf32, #tpu.memory_space<vmem>>, vector<1x8x8xf32>
    %166 = vector.shape_cast %165 : vector<1x8x8xf32> to vector<8x8xf32>
    %167 = vector.shape_cast %163 : vector<8x8xf32> to vector<1x8x8xf32>
    tpu.vector_store %arg7[%164, %c0_64, %c0_65], %167 {strides = array<i32>} : memref<8x8x8xf32, #tpu.memory_space<vmem>>, vector<1x8x8xf32>,
    %c8_i32 = arith.constant 8 : i32
    %c0_66 = arith.constant 0 : index
    %c0_67 = arith.constant 0 : index
    %c0_68 = arith.constant 0 : index
    %168 = vector.load %arg7[%c0_66, %c0_67, %c0_68] : memref<8x8x8xf32, #tpu.memory_space<vmem>>, vector<8x8x8xf32>
    %169 = vector.shape_cast %168 : vector<8x8x8xf32> to vector<64x8xf32>
    %170 = arith.truncf %169 : vector<64x8xf32> to vector<64x8xbf16>
    %c0_69 = arith.constant 0 : index
    %c0_70 = arith.constant 0 : index
    %171 = vector.load %arg5[%c0_69, %c0_70] : memref<8x4xbf16, #tpu.memory_space<vmem>>, vector<8x4xbf16>
    %cst_71 = arith.constant dense<0.000000e+00> : vector<64x4xf32>
    %172 = tpu.matmul %170, %171, %cst_71 {dimension_numbers = #tpu.dot_dimension_numbers<[1], [0], [0], [1], [0, 0, 1, 1], [], []>} : vector<64x8xbf16>, vector<8x4xbf16>, vector<64x4xf32> -> vector<64x4xf32>
    %173 = vector.shape_cast %172 : vector<64x4xf32> to vector<1x8x8x4xf32>
    %c0_72 = arith.constant 0 : index
    %c0_73 = arith.constant 0 : index
    %c0_74 = arith.constant 0 : index
    %c0_75 = arith.constant 0 : index
    %174 = vector.load %arg6[%c0_72, %c0_73, %c0_74, %c0_75] : memref<1x8x8x4xf32, #tpu.memory_space<vmem>>, vector<1x8x8x4xf32>
    tpu.vector_store %arg6[%c0_72, %c0_73, %c0_74, %c0_75], %173 {strides = array<i32>} : memref<1x8x8x4xf32, #tpu.memory_space<vmem>>, vector<1x8x8x4xf32>,
    return
  }
  func.func @transform_0(%arg0: i32, %arg1: i32) -> (i32, i32, i32, i32) {
    %c0_i32 = arith.constant 0 : i32
    %c0_i32_0 = arith.constant 0 : i32
    %c0_i32_1 = arith.constant 0 : i32
    return %arg0, %arg1, %c0_i32, %c0_i32_0 : i32, i32, i32, i32
  }
  func.func @transform_1(%arg0: i32, %arg1: i32) -> (i32, i32) {
    %c0_i32 = arith.constant 0 : i32
    %c0_i32_0 = arith.constant 0 : i32
    %c0_i32_1 = arith.constant 0 : i32
    return %c0_i32, %c0_i32_0 : i32, i32
  }
  func.func @transform_2(%arg0: i32, %arg1: i32) -> (i32, i32) {
    %c0_i32 = arith.constant 0 : i32
    %c0_i32_0 = arith.constant 0 : i32
    %c0_i32_1 = arith.constant 0 : i32
    return %c0_i32, %c0_i32_0 : i32, i32
  }
  func.func @transform_3(%arg0: i32, %arg1: i32) -> (i32, i32) {
    %c0_i32 = arith.constant 0 : i32
    %c0_i32_0 = arith.constant 0 : i32
    %c0_i32_1 = arith.constant 0 : i32
    return %c0_i32, %c0_i32_0 : i32, i32
  }
  func.func @transform_4(%arg0: i32, %arg1: i32) -> (i32, i32, i32, i32) {
    %c0_i32 = arith.constant 0 : i32
    %c0_i32_0 = arith.constant 0 : i32
    %c0_i32_1 = arith.constant 0 : i32
    return %arg0, %arg1, %c0_i32, %c0_i32_0 : i32, i32, i32, i32
  }
}

</mosaic_0001>

<bundles_post_ra>
// kernel: tpu_custom_call.1
= control target key start
LH: loop header
LB: loop body
LE: loop exit
PB: predicated region body
PF: predicated region fallthrough
CT: control target
= control target key end

     0   :  { %s1410_s15 = smov 0   ;;  %s1412_s16 = smov 0   ;;  %s1797_s0 = inlined_call_operand.vmem [shape: f32[2,16,16,8], index: 0, kind: input, shape index: {}]   ;;  %s1798_s1 = inlined_call_operand.vmem [shape: f32[1,8], index: 1, kind: input, shape index: {}]   ;;  %s1799_s2 = inlined_call_operand.vmem [shape: f32[1,8], index: 2, kind: input, shape index: {}]   ;;  %s1800_s3 = inlined_call_operand.vmem [shape: bf16[8,4], index: 3, kind: input, shape index: {}]   ;;  %s1801_s4 = inlined_call_operand.vmem [shape: f32[2,8,8,4], index: 4, kind: output, shape index: {}]  }
   0x1   :  { %s1414_s17 = smov 0  }
   0x2 LB: > { %s26_s18 = sadd.s32 1, %s1379_s16  ;;  %p1289_p0 = scmp.ge.s32.totalorder %s1383_s17, 1  ;;  %s1383_s17 = sphi %s1414_s17, %s14_s17   ;;  %s1379_s16 = sphi %s1412_s16, %s1803_s16   ;;  %s1375_s15 = sphi %s1410_s15, %s1802_s15  }
   0x3   : > { %p28_p1 = scmp.ge.s32.totalorder %s26_s18, 2  ;;  %p184_p2 = scmp.lt.s32.totalorder %s1383_s17, 3 }
   0x5   : > { %s1805_s18 = smov (%p28_p1, %s26_s18), 0  ;;  %p185_p3 = pnand %p1289_p0, %p184_p2 }
   0x6   : > { %p220_p4 = scmp.lt.s32.totalorder (!%p185_p3), %s1375_s15, 1 }
   0x7   : > { %188 = sbr.rel (%p185_p3) target bundleno = 340 (0x154), region = 36 }
   0xc   : > { %v1133_v0 = vld [vmem:[%s1800_s3] sm:$0xf]  ;;  %vm1146_vm0 = vcmask 1043456   ;;  %s1807_s15 = smov (!%p220_p4, %s1375_s15), 1  ;;  %vm283_vm1 = vcmask 58368   ;;  %vm348_vm2 = vcmask 1041409  }
   0xd   : > { %v1148_v1 = vsel %vm1146_vm0, %v1133_v0, 0  ;;  %v1436_v2 = vld [vmem:[%s1798_s1] ss:$0 sm:$0xff]  ;;  %s1328_s23 = sshll.u32 %s1807_s15, 8  ;;  %vm350_vm3 = vcmask 1042434   ;;  %vm352_vm4 = vcmask 1043459  }
   0xe   : > { %1157 = vmatpush.bf16.msra.mxu0 %v1148_v1  ;;  %1330 = vmatpush.bf16.msra.mxu1 %v1148_v1  ;;  %s1442_s26 = scalar_lea.vmem %s1797_s0, %s1328_s23  ;;  %v1447_v3 = vld [vmem:[%s1799_s2] ss:$0 sm:$0xff]  ;;  %vm354_vm5 = vcmask 1044484   ;;  %vm356_vm6 = vcmask 1045509   ;;  %vm358_vm7 = vcmask 1046534   ;;  %vm360_vm8 = vcmask 1047559  }
   0xf   : > { %1331 = vmatpush.bf16.msra.mxu2 %v1148_v1  ;;  %1332 = vmatpush.bf16.msra.mxu3 %v1148_v1  ;;  %v251_v4 = vld [vmem:[%s1442_s26] sm:$0xff]  ;;  %v252_v5 = vld [vmem:[%s1442_s26 + $0x8] sm:$0xff]  ;;  %v253_v6 = vld [vmem:[%s1442_s26 + $0x10] sm:$0xff]  ;;  %vm363_vm9 = vcmask 64512   ;;  %s1329_s7 = sshll.u32 %s1807_s15, 6  ;;  %vm1179_vm10 = vcmask 31744  }
  0x10   : > { %v254_v7 = vld [vmem:[%s1442_s26 + $0x18] sm:$0xff]  ;;  %v255_v8 = vmul.f32 %v1436_v2, %v251_v4  ;;  %v256_v9 = vmul.f32 %v1436_v2, %v252_v5  ;;  %v257_v10 = vmul.f32 %v1436_v2, %v253_v6  ;;  %v1294_v11 = vld [vmem:[%s1442_s26 + $0x20] sm:$0xff]  ;;  %v1295_v12 = vld [vmem:[%s1442_s26 + $0x28] sm:$0xff]  ;;  %s238_s10 = scalar_lea.vmem %s1801_s4, %s1329_s7 }
  0x11   : > { %v258_v13 = vmul.f32 %v1436_v2, %v254_v7  ;;  %v1296_v14 = vld [vmem:[%s1442_s26 + $0x30] sm:$0xff]  ;;  %v1297_v15 = vld [vmem:[%s1442_s26 + $0x38] sm:$0xff]  ;;  %v371_v16 = vmul.f32 %v1436_v2, %v1294_v11  ;;  %v372_v17 = vmul.f32 %v1436_v2, %v1295_v12  ;;  %v1298_v26 = vld [vmem:[%s1442_s26 + $0x40] sm:$0xff] }
  0x12   : > { %v259_v18 = vadd.f32 %v1447_v3, %v255_v8  ;;  %v260_v19 = vadd.f32 %v1447_v3, %v256_v9  ;;  %v261_v20 = vadd.f32 %v1447_v3, %v257_v10  ;;  %v373_v21 = vmul.f32 %v1436_v2, %v1296_v14  ;;  %v1299_v27 = vld [vmem:[%s1442_s26 + $0x48] sm:$0xff]  ;;  %v1300_v32 = vld [vmem:[%s1442_s26 + $0x50] sm:$0xff]  ;;  %v1301_v33 = vld [vmem:[%s1442_s26 + $0x58] sm:$0xff] }
  0x13   : > { %v262_v22 = vadd.f32 %v1447_v3, %v258_v13  ;;  %v374_v23 = vmul.f32 %v1436_v2, %v1297_v15  ;;  %v1470_v24 = vadd.f32 %v1447_v3, %v371_v16  ;;  %v1473_v25 = vadd.f32 %v1447_v3, %v372_v17 }
  0x14   : > { %v263_v28 = vmax.f32 %v259_v18, 0.0  ;;  %v264_v29 = vmax.f32 %v260_v19, 0.0  ;;  %v265_v30 = vmax.f32 %v261_v20, 0.0  ;;  %v1478_v31 = vadd.f32 %v1447_v3, %v373_v21 }
  0x15   : > { %v266_v34 = vmax.f32 %v262_v22, 0.0  ;;  %v1483_v35 = vadd.f32 %v1447_v3, %v374_v23  ;;  %v379_v36 = vmax.f32 %v1470_v24, 0.0  ;;  %v380_v37 = vmax.f32 %v1473_v25, 0.0 }
  0x16   : > { %v267_v38 = vadd.f32 %v265_v30, %v263_v28  ;;  %v381_v39 = vmax.f32 %v1478_v31, 0.0  ;;  %v1489_v40 = vmul.f32 %v1436_v2, %v1298_v26  ;;  %v1492_v41 = vmul.f32 %v1436_v2, %v1299_v27 }
  0x17   : > { %v268_v42 = vadd.f32 %v266_v34, %v264_v29  ;;  %v382_v43 = vmax.f32 %v1483_v35, 0.0  ;;  %v1496_v44 = vmul.f32 %v1436_v2, %v1300_v32  ;;  %v1499_v45 = vmul.f32 %v1436_v2, %v1301_v33 }
  0x18   : > { %v271_v46 = vrot.slane %v267_v38, 2  ;;  %v272_v47 = vrot.slane %v267_v38, 4  ;;  %v273_v48 = vrot.slane %v267_v38, 6  ;;  %v284_v49 = vsel %vm283_vm1, %v267_v38, 0.0 }
  0x19   : > { %v274_v50 = vrot.slane %v268_v42, 2  ;;  %v275_v51 = vrot.slane %v268_v42, 4  ;;  %v276_v52 = vrot.slane %v268_v42, 6  ;;  %v285_v53 = vrot.slane %v284_v49, 4 }
  0x1a   : > { %v291_v54 = vsel %vm283_vm1, %v271_v46, 0.0  ;;  %v298_v55 = vsel %vm283_vm1, %v272_v47, 0.0  ;;  %v305_v56 = vsel %vm283_vm1, %v273_v48, 0.0  ;;  %v312_v57 = vsel %vm283_vm1, %v268_v42, 0.0 }
  0x1b   : > { %v286_v58 = vadd.f32 %v285_v53, %v284_v49  ;;  %v292_v59 = vrot.slane %v291_v54, 4  ;;  %v299_v60 = vrot.slane %v298_v55, 4  ;;  %v306_v61 = vrot.slane %v305_v56, 4 }
  0x1c   : > { %v313_v62 = vrot.slane %v312_v57, 4  ;;  %v319_v63 = vsel %vm283_vm1, %v274_v50, 0.0  ;;  %v326_v0 = vsel %vm283_vm1, %v275_v51, 0.0  ;;  %v333_v1 = vsel %vm283_vm1, %v276_v52, 0.0 }
  0x1d   : > { %v287_v4 = vrot.slane %v286_v58, 2  ;;  %v293_v5 = vadd.f32 %v292_v59, %v291_v54  ;;  %v300_v6 = vadd.f32 %v299_v60, %v298_v55  ;;  %v307_v7 = vadd.f32 %v306_v61, %v305_v56 }
  0x1e   : > { %v314_v8 = vadd.f32 %v313_v62, %v312_v57  ;;  %v320_v9 = vrot.slane %v319_v63, 4  ;;  %v327_v10 = vrot.slane %v326_v0, 4  ;;  %v334_v11 = vrot.slane %v333_v1, 4 }
  0x1f   : > { %v288_v12 = vadd.f32 %v287_v4, %v286_v58  ;;  %v294_v13 = vrot.slane %v293_v5, 2  ;;  %v301_v14 = vrot.slane %v300_v6, 2  ;;  %v308_v15 = vrot.slane %v307_v7, 2 }
  0x20   : > { %v315_v16 = vrot.slane %v314_v8, 2  ;;  %v321_v17 = vadd.f32 %v320_v9, %v319_v63  ;;  %v328_v18 = vadd.f32 %v327_v10, %v326_v0  ;;  %v335_v19 = vadd.f32 %v334_v11, %v333_v1 }
  0x21   : > { %v289_v20 = vrot.slane %v288_v12, 1  ;;  %v295_v21 = vadd.f32 %v294_v13, %v293_v5  ;;  %v302_v22 = vadd.f32 %v301_v14, %v300_v6  ;;  %v309_v23 = vadd.f32 %v308_v15, %v307_v7 }
  0x22   : > { %v316_v26 = vadd.f32 %v315_v16, %v314_v8  ;;  %v322_v27 = vrot.slane %v321_v17, 2  ;;  %v329_v28 = vrot.slane %v328_v18, 2  ;;  %v336_v29 = vrot.slane %v335_v19, 2 }
  0x23   : > { %v290_v30 = vadd.f32 %v289_v20, %v288_v12  ;;  %v296_v32 = vrot.slane %v295_v21, 1  ;;  %v303_v33 = vrot.slane %v302_v22, 1  ;;  %v310_v34 = vrot.slane %v309_v23, 1 }
  0x24   : > { %v317_v38 = vrot.slane %v316_v26, 1  ;;  %v323_v42 = vadd.f32 %v322_v27, %v321_v17  ;;  %v330_v46 = vadd.f32 %v329_v28, %v328_v18  ;;  %v337_v47 = vadd.f32 %v336_v29, %v335_v19 }
  0x25   : > { %v297_v48 = vadd.f32 %v296_v32, %v295_v21  ;;  %v304_v49 = vadd.f32 %v303_v33, %v302_v22  ;;  %v311_v50 = vadd.f32 %v310_v34, %v309_v23  ;;  %v383_v51 = vadd.f32 %v381_v39, %v379_v36 }
  0x26   : > { %v318_v52 = vadd.f32 %v317_v38, %v316_v26  ;;  %v324_v53 = vrot.slane %v323_v42, 1  ;;  %v331_v54 = vrot.slane %v330_v46, 1  ;;  %v338_v55 = vrot.slane %v337_v47, 1 }
  0x27   : > { %v349_v56 = vsel %vm348_vm2, %v297_v48, %v290_v30  ;;  %v384_v57 = vadd.f32 %v382_v43, %v380_v37  ;;  %v387_v58 = vrot.slane %v383_v51, 2  ;;  %v388_v59 = vrot.slane %v383_v51, 4 }
  0x28   : > { %v325_v60 = vadd.f32 %v324_v53, %v323_v42  ;;  %v332_v61 = vadd.f32 %v331_v54, %v330_v46  ;;  %v339_v62 = vadd.f32 %v338_v55, %v337_v47  ;;  %v351_v24 = vsel %vm350_vm3, %v304_v49, %v349_v56 }
  0x29   : > { %v353_v31 = vsel %vm352_vm4, %v311_v50, %v351_v24  ;;  %v389_v36 = vrot.slane %v383_v51, 6  ;;  %v390_v39 = vrot.slane %v384_v57, 2  ;;  %v391_v63 = vrot.slane %v384_v57, 4 }
  0x2a   : > { %v355_v0 = vsel %vm354_vm5, %v318_v52, %v353_v31  ;;  %v392_v1 = vrot.slane %v384_v57, 6  ;;  %v399_v25 = vsel %vm283_vm1, %v383_v51, 0.0  ;;  %v406_v35 = vsel %vm283_vm1, %v387_v58, 0.0 }
  0x2b   : > { %v357_v37 = vsel %vm356_vm6, %v325_v60, %v355_v0  ;;  %v400_v43 = vrot.slane %v399_v25, 4  ;;  %v407_v4 = vrot.slane %v406_v35, 4  ;;  %v413_v5 = vsel %vm283_vm1, %v388_v59, 0.0 }
  0x2c   : > { %v359_v6 = vsel %vm358_vm7, %v332_v61, %v357_v37  ;;  %v414_v7 = vrot.slane %v413_v5, 4  ;;  %v420_v8 = vsel %vm283_vm1, %v389_v36, 0.0  ;;  %v427_v9 = vsel %vm283_vm1, %v384_v57, 0.0 }
  0x2d   : > { %v361_v10 = vsel %vm360_vm8, %v339_v62, %v359_v6  ;;  %v401_v11 = vadd.f32 %v400_v43, %v399_v25  ;;  %v408_v12 = vadd.f32 %v407_v4, %v406_v35  ;;  %v421_v13 = vrot.slane %v420_v8, 4  ;;  %v1302_v4 = vld [vmem:[%s1442_s26 + $0x60] sm:$0xff] }
  0x2e   : > { %364 = vst.msk [vmem:[#allocation2] sm:$0xff] %vm363_vm9, %v361_v10  ;;  %v415_v14 = vadd.f32 %v414_v7, %v413_v5  ;;  %v428_v15 = vrot.slane %v427_v9, 4  ;;  %v434_v16 = vsel %vm283_vm1, %v390_v39, 0.0  ;;  %v441_v17 = vsel %vm283_vm1, %v391_v63, 0.0  ;;  %v1305_v10 = vld [vmem:[%s1442_s26 + $0x78] sm:$0xff] }
  0x2f   : > { %v402_v18 = vrot.slane %v401_v11, 2  ;;  %v409_v19 = vrot.slane %v408_v12, 2  ;;  %v422_v20 = vadd.f32 %v421_v13, %v420_v8  ;;  %v435_v21 = vrot.slane %v434_v16, 4  ;;  %v1303_v8 = vld [vmem:[%s1442_s26 + $0x68] sm:$0xff] }
  0x30   : > { %v416_v22 = vrot.slane %v415_v14, 2  ;;  %v429_v23 = vadd.f32 %v428_v15, %v427_v9  ;;  %v442_v26 = vrot.slane %v441_v17, 4  ;;  %v448_v27 = vsel %vm283_vm1, %v392_v1, 0.0  ;;  %v1304_v9 = vld [vmem:[%s1442_s26 + $0x70] sm:$0xff] }
  0x31   : > { %v403_v28 = vadd.f32 %v402_v18, %v401_v11  ;;  %v410_v29 = vadd.f32 %v409_v19, %v408_v12  ;;  %v423_v30 = vrot.slane %v422_v20, 2  ;;  %v436_v32 = vadd.f32 %v435_v21, %v434_v16 }
  0x32   : > { %v417_v33 = vadd.f32 %v416_v22, %v415_v14  ;;  %v430_v34 = vrot.slane %v429_v23, 2  ;;  %v443_v38 = vadd.f32 %v442_v26, %v441_v17  ;;  %v449_v42 = vrot.slane %v448_v27, 4 }
  0x33   : > { %v404_v46 = vrot.slane %v403_v28, 1  ;;  %v411_v47 = vrot.slane %v410_v29, 1  ;;  %v424_v48 = vadd.f32 %v423_v30, %v422_v20  ;;  %v437_v49 = vrot.slane %v436_v32, 2 }
  0x34   : > { %v418_v50 = vrot.slane %v417_v33, 1  ;;  %v431_v51 = vadd.f32 %v430_v34, %v429_v23  ;;  %v444_v52 = vrot.slane %v443_v38, 2  ;;  %v450_v53 = vadd.f32 %v449_v42, %v448_v27 }
  0x35   : > { %v405_v54 = vadd.f32 %v404_v46, %v403_v28  ;;  %v412_v55 = vadd.f32 %v411_v47, %v410_v29  ;;  %v425_v56 = vrot.slane %v424_v48, 1  ;;  %v438_v57 = vadd.f32 %v437_v49, %v436_v32 }
  0x36   : > { %v419_v58 = vadd.f32 %v418_v50, %v417_v33  ;;  %v432_v59 = vrot.slane %v431_v51, 1  ;;  %v445_v60 = vadd.f32 %v444_v52, %v443_v38  ;;  %v451_v61 = vrot.slane %v450_v53, 2 }
  0x37   : > { %v426_v62 = vadd.f32 %v425_v56, %v424_v48  ;;  %v439_v24 = vrot.slane %v438_v57, 1  ;;  %v463_v31 = vsel %vm348_vm2, %v412_v55, %v405_v54  ;;  %v483_v36 = vadd.f32 %v1447_v3, %v1489_v40 }
  0x38   : > { %v433_v39 = vadd.f32 %v432_v59, %v431_v51  ;;  %v446_v63 = vrot.slane %v445_v60, 1  ;;  %v452_v0 = vadd.f32 %v451_v61, %v450_v53  ;;  %v464_v1 = vsel %vm350_vm3, %v419_v58, %v463_v31 }
  0x39   : > { %v440_v25 = vadd.f32 %v439_v24, %v438_v57  ;;  %v465_v35 = vsel %vm352_vm4, %v426_v62, %v464_v1  ;;  %v484_v37 = vadd.f32 %v1447_v3, %v1492_v41  ;;  %v485_v43 = vadd.f32 %v1447_v3, %v1496_v44  ;;  %v1306_v41 = vld [vmem:[%s1442_s26 + $0x80] sm:$0xff] }
  0x3a   : > { %v447_v5 = vadd.f32 %v446_v63, %v445_v60  ;;  %v453_v6 = vrot.slane %v452_v0, 1  ;;  %v466_v40 = vsel %vm354_vm5, %v433_v39, %v465_v35  ;;  %v486_v7 = vadd.f32 %v1447_v3, %v1499_v45  ;;  %v1121_v57 = vld [vmem:[#allocation2] sm:$0xff] }
  0x3b   : > { %v467_v11 = vsel %vm356_vm6, %v440_v25, %v466_v40  ;;  %v487_v12 = vmax.f32 %v483_v36, 0.0  ;;  %v488_v13 = vmax.f32 %v484_v37, 0.0  ;;  %v489_v14 = vmax.f32 %v485_v43, 0.0 }
  0x3c   : > { %v454_v15 = vadd.f32 %v453_v6, %v452_v0  ;;  %v468_v44 = vsel %vm358_vm7, %v447_v5, %v467_v11  ;;  %v490_v16 = vmax.f32 %v486_v7, 0.0  ;;  %v587_v17 = vmul.f32 %v1436_v2, %v1302_v4 }
  0x3d   : > { %v491_v18 = vadd.f32 %v489_v14, %v487_v12  ;;  %v1554_v19 = vmul.f32 %v1436_v2, %v1303_v8  ;;  %v1557_v45 = vmul.f32 %v1436_v2, %v1304_v9  ;;  %v1560_v20 = vmul.f32 %v1436_v2, %v1305_v10 }
  0x3e   : > { %v469_v21 = vsel %vm360_vm8, %v454_v15, %v468_v44  ;;  %v492_v22 = vadd.f32 %v490_v16, %v488_v13  ;;  %v1564_v23 = vadd.f32 %v1447_v3, %v587_v17  ;;  %v1567_v26 = vmul.f32 %v1436_v2, %v1306_v41 }
  0x3f   : > { %472 = vst.msk [vmem:[#allocation2 + $0x8] sm:$0xff] %vm363_vm9, %v469_v21  ;;  %v495_v27 = vrot.slane %v491_v18, 2  ;;  %v496_v28 = vrot.slane %v491_v18, 4  ;;  %v497_v29 = vrot.slane %v491_v18, 6  ;;  %v507_v30 = vsel %vm283_vm1, %v491_v18, 0.0 }
  0x40   : > { %v498_v32 = vrot.slane %v492_v22, 2  ;;  %v499_v33 = vrot.slane %v492_v22, 4  ;;  %v500_v34 = vrot.slane %v492_v22, 6  ;;  %v508_v38 = vrot.slane %v507_v30, 4 }
  0x41   : > { %v514_v42 = vsel %vm283_vm1, %v495_v27, 0.0  ;;  %v521_v46 = vsel %vm283_vm1, %v496_v28, 0.0  ;;  %v528_v47 = vsel %vm283_vm1, %v497_v29, 0.0  ;;  %v535_v48 = vsel %vm283_vm1, %v492_v22, 0.0 }
  0x42   : > { %v509_v49 = vadd.f32 %v508_v38, %v507_v30  ;;  %v515_v50 = vrot.slane %v514_v42, 4  ;;  %v522_v51 = vrot.slane %v521_v46, 4  ;;  %v529_v52 = vrot.slane %v528_v47, 4 }
  0x43   : > { %v536_v53 = vrot.slane %v535_v48, 4  ;;  %v542_v54 = vsel %vm283_vm1, %v498_v32, 0.0  ;;  %v549_v55 = vsel %vm283_vm1, %v499_v33, 0.0  ;;  %v556_v56 = vsel %vm283_vm1, %v500_v34, 0.0 }
  0x44   : > { %v510_v58 = vrot.slane %v509_v49, 2  ;;  %v516_v59 = vadd.f32 %v515_v50, %v514_v42  ;;  %v523_v60 = vadd.f32 %v522_v51, %v521_v46  ;;  %v530_v61 = vadd.f32 %v529_v52, %v528_v47  ;;  %v1307_v46 = vld [vmem:[%s1442_s26 + $0x88] sm:$0xff]  ;;  %v1308_v47 = vld [vmem:[%s1442_s26 + $0x90] sm:$0xff]  ;;  %v1309_v51 = vld [vmem:[%s1442_s26 + $0x98] sm:$0xff] }
  0x45   : > { %v537_v62 = vadd.f32 %v536_v53, %v535_v48  ;;  %v543_v24 = vrot.slane %v542_v54, 4  ;;  %v550_v31 = vrot.slane %v549_v55, 4  ;;  %v557_v36 = vrot.slane %v556_v56, 4 }
  0x46   : > { %v1122_v39 = vld [vmem:[#allocation2 + $0x8] sm:$0xff]  ;;  %v511_v63 = vadd.f32 %v510_v58, %v509_v49  ;;  %v517_v0 = vrot.slane %v516_v59, 2  ;;  %v524_v1 = vrot.slane %v523_v60, 2  ;;  %v531_v25 = vrot.slane %v530_v61, 2 }
  0x47   : > { %v1129_v35 = vpack.c.bf16 %v1122_v39, %v1121_v57  ;;  %v538_v37 = vrot.slane %v537_v62, 2  ;;  %v544_v43 = vadd.f32 %v543_v24, %v542_v54  ;;  %v551_v4 = vadd.f32 %v550_v31, %v549_v55 }
  0x48   : > { %v512_v5 = vrot.slane %v511_v63, 1  ;;  %v518_v6 = vadd.f32 %v517_v0, %v516_v59  ;;  %v525_v40 = vadd.f32 %v524_v1, %v523_v60  ;;  %v532_v7 = vadd.f32 %v531_v25, %v530_v61 }
  0x49   : > { %1322 = vmatmul.msk.bf16.vlgmr.msra.gmra.mxu0 %vm363_vm9, %v1129_v35  ;;  %v539_v8 = vadd.f32 %v538_v37, %v537_v62  ;;  %v545_v9 = vrot.slane %v544_v43, 2  ;;  %v552_v10 = vrot.slane %v551_v4, 2  ;;  %v558_v11 = vadd.f32 %v557_v36, %v556_v56 }
  0x4a   : > { %v513_v12 = vadd.f32 %v512_v5, %v511_v63  ;;  %v519_v13 = vrot.slane %v518_v6, 1  ;;  %v526_v14 = vrot.slane %v525_v40, 1  ;;  %v533_v41 = vrot.slane %v532_v7, 1 }
  0x4b   : > { %v540_v15 = vrot.slane %v539_v8, 1  ;;  %v546_v44 = vadd.f32 %v545_v9, %v544_v43  ;;  %v553_v16 = vadd.f32 %v552_v10, %v551_v4  ;;  %v559_v17 = vrot.slane %v558_v11, 2 }
  0x4c   : > { %v520_v18 = vadd.f32 %v519_v13, %v518_v6  ;;  %v527_v21 = vadd.f32 %v526_v14, %v525_v40  ;;  %v534_v22 = vadd.f32 %v533_v41, %v532_v7  ;;  %v592_v27 = vadd.f32 %v1447_v3, %v1554_v19 }
  0x4d   : > { %v541_v28 = vadd.f32 %v540_v15, %v539_v8  ;;  %v547_v29 = vrot.slane %v546_v44, 1  ;;  %v554_v30 = vrot.slane %v553_v16, 1  ;;  %v560_v32 = vadd.f32 %v559_v17, %v558_v11 }
  0x4e   : > { %v571_v33 = vsel %vm348_vm2, %v520_v18, %v513_v12  ;;  %v593_v34 = vadd.f32 %v1447_v3, %v1557_v45  ;;  %v594_v38 = vadd.f32 %v1447_v3, %v1560_v20  ;;  %v595_v42 = vmax.f32 %v1564_v23, 0.0 }
  0x4f   : > { %v548_v48 = vadd.f32 %v547_v29, %v546_v44  ;;  %v555_v49 = vadd.f32 %v554_v30, %v553_v16  ;;  %v561_v50 = vrot.slane %v560_v32, 1  ;;  %v572_v19 = vsel %vm350_vm3, %v527_v21, %v571_v33 }
  0x50   : > { %v573_v52 = vsel %vm352_vm4, %v534_v22, %v572_v19  ;;  %v596_v53 = vmax.f32 %v592_v27, 0.0  ;;  %v597_v54 = vmax.f32 %v593_v34, 0.0  ;;  %v598_v55 = vmax.f32 %v594_v38, 0.0 }
  0x51   : > { %v562_v56 = vadd.f32 %v561_v50, %v560_v32  ;;  %v574_v45 = vsel %vm354_vm5, %v541_v28, %v573_v52  ;;  %v696_v20 = vmul.f32 %v1436_v2, %v1307_v46  ;;  %v697_v23 = vmul.f32 %v1436_v2, %v1308_v47 }
  0x52   : > { %v575_v57 = vsel %vm356_vm6, %v548_v48, %v574_v45  ;;  %v599_v58 = vadd.f32 %v597_v54, %v595_v42  ;;  %v600_v59 = vadd.f32 %v598_v55, %v596_v53  ;;  %v1597_v60 = vmul.f32 %v1436_v2, %v1309_v51 }
  0x53   : > { %v576_v61 = vsel %vm358_vm7, %v555_v49, %v575_v57  ;;  %v1602_v62 = vadd.f32 %v1447_v3, %v1567_v26  ;;  %v1605_v24 = vadd.f32 %v1447_v3, %v696_v20  ;;  %v1608_v31 = vadd.f32 %v1447_v3, %v697_v23 }
  0x54   : > { %v577_v36 = vsel %vm360_vm8, %v562_v56, %v576_v61  ;;  %v603_v39 = vrot.slane %v599_v58, 2  ;;  %v604_v63 = vrot.slane %v599_v58, 4  ;;  %v605_v0 = vrot.slane %v599_v58, 6 }
  0x55   : > { %580 = vst.msk [vmem:[#allocation2 + $0x10] sm:$0xff] %vm363_vm9, %v577_v36  ;;  %v606_v1 = vrot.slane %v600_v59, 2  ;;  %v607_v25 = vrot.slane %v600_v59, 4  ;;  %v608_v35 = vrot.slane %v600_v59, 6  ;;  %v615_v37 = vsel %vm283_vm1, %v599_v58, 0.0 }
  0x56   : > { %v616_v26 = vrot.slane %v615_v37, 4  ;;  %v622_v43 = vsel %vm283_vm1, %v603_v39, 0.0  ;;  %v629_v4 = vsel %vm283_vm1, %v604_v63, 0.0  ;;  %v636_v5 = vsel %vm283_vm1, %v605_v0, 0.0  ;;  %v1310_v63 = vld [vmem:[%s1442_s26 + $0xa0] sm:$0xff]  ;;  %v1311_v0 = vld [vmem:[%s1442_s26 + $0xa8] sm:$0xff] }
  0x57   : > { %v623_v6 = vrot.slane %v622_v43, 4  ;;  %v630_v40 = vrot.slane %v629_v4, 4  ;;  %v637_v7 = vrot.slane %v636_v5, 4  ;;  %v643_v8 = vsel %vm283_vm1, %v600_v59, 0.0 }
  0x58   : > { %v617_v9 = vadd.f32 %v616_v26, %v615_v37  ;;  %v644_v10 = vrot.slane %v643_v8, 4  ;;  %v650_v11 = vsel %vm283_vm1, %v606_v1, 0.0  ;;  %v657_v12 = vsel %vm283_vm1, %v607_v25, 0.0  ;;  %v1312_v26 = vld [vmem:[%s1442_s26 + $0xb0] sm:$0xff] }
  0x59   : > { %v624_v13 = vadd.f32 %v623_v6, %v622_v43  ;;  %v631_v14 = vadd.f32 %v630_v40, %v629_v4  ;;  %v638_v41 = vadd.f32 %v637_v7, %v636_v5  ;;  %v651_v15 = vrot.slane %v650_v11, 4  ;;  %v1313_v40 = vld [vmem:[%s1442_s26 + $0xb8] sm:$0xff] }
  0x5a   : > { %v618_v44 = vrot.slane %v617_v9, 2  ;;  %v645_v16 = vadd.f32 %v644_v10, %v643_v8  ;;  %v658_v17 = vrot.slane %v657_v12, 4  ;;  %v664_v18 = vsel %vm283_vm1, %v608_v35, 0.0 }
  0x5b   : > { %v625_v21 = vrot.slane %v624_v13, 2  ;;  %v632_v22 = vrot.slane %v631_v14, 2  ;;  %v639_v27 = vrot.slane %v638_v41, 2  ;;  %v652_v28 = vadd.f32 %v651_v15, %v650_v11 }
  0x5c   : > { %v619_v29 = vadd.f32 %v618_v44, %v617_v9  ;;  %v646_v30 = vrot.slane %v645_v16, 2  ;;  %v659_v32 = vadd.f32 %v658_v17, %v657_v12  ;;  %v665_v33 = vrot.slane %v664_v18, 4 }
  0x5d   : > { %v626_v34 = vadd.f32 %v625_v21, %v624_v13  ;;  %v633_v38 = vadd.f32 %v632_v22, %v631_v14  ;;  %v640_v42 = vadd.f32 %v639_v27, %v638_v41  ;;  %v653_v46 = vrot.slane %v652_v28, 2 }
  0x5e   : > { %v620_v47 = vrot.slane %v619_v29, 1  ;;  %v647_v48 = vadd.f32 %v646_v30, %v645_v16  ;;  %v660_v49 = vrot.slane %v659_v32, 2  ;;  %v666_v50 = vadd.f32 %v665_v33, %v664_v18 }
  0x5f   : > { %v627_v19 = vrot.slane %v626_v34, 1  ;;  %v634_v51 = vrot.slane %v633_v38, 1  ;;  %v641_v52 = vrot.slane %v640_v42, 1  ;;  %v654_v53 = vadd.f32 %v653_v46, %v652_v28 }
  0x60   : > { %v621_v54 = vadd.f32 %v620_v47, %v619_v29  ;;  %v648_v55 = vrot.slane %v647_v48, 1  ;;  %v661_v56 = vadd.f32 %v660_v49, %v659_v32  ;;  %v667_v45 = vrot.slane %v666_v50, 2 }
  0x61   : > { %v628_v20 = vadd.f32 %v627_v19, %v626_v34  ;;  %v635_v23 = vadd.f32 %v634_v51, %v633_v38  ;;  %v642_v57 = vadd.f32 %v641_v52, %v640_v42  ;;  %v655_v58 = vrot.slane %v654_v53, 1 }
  0x62   : > { %v649_v59 = vadd.f32 %v648_v55, %v647_v48  ;;  %v662_v61 = vrot.slane %v661_v56, 1  ;;  %v668_v36 = vadd.f32 %v667_v45, %v666_v50  ;;  %v702_v39 = vadd.f32 %v1447_v3, %v1597_v60 }
  0x63   : > { %v656_v1 = vadd.f32 %v655_v58, %v654_v53  ;;  %v679_v25 = vsel %vm348_vm2, %v628_v20, %v621_v54  ;;  %v703_v35 = vmax.f32 %v1602_v62, 0.0  ;;  %v704_v37 = vmax.f32 %v1605_v24, 0.0 }
  0x64   : > { %v663_v43 = vadd.f32 %v662_v61, %v661_v56  ;;  %v669_v4 = vrot.slane %v668_v36, 1  ;;  %v680_v5 = vsel %vm350_vm3, %v635_v23, %v679_v25  ;;  %v705_v6 = vmax.f32 %v1608_v31, 0.0  ;;  %v1123_v56 = vld [vmem:[#allocation2 + $0x10] sm:$0xff] }
  0x65   : > { %v681_v7 = vsel %vm352_vm4, %v642_v57, %v680_v5  ;;  %v706_v60 = vmax.f32 %v702_v39, 0.0  ;;  %v803_v8 = vmul.f32 %v1436_v2, %v1310_v63  ;;  %v1634_v9 = vmul.f32 %v1436_v2, %v1311_v0 }
  0x66   : > { %v670_v10 = vadd.f32 %v669_v4, %v668_v36  ;;  %v682_v62 = vsel %vm354_vm5, %v649_v59, %v681_v7  ;;  %v707_v24 = vadd.f32 %v705_v6, %v703_v35  ;;  %v1638_v11 = vmul.f32 %v1436_v2, %v1312_v26 }
  0x67   : > { %v683_v12 = vsel %vm356_vm6, %v656_v1, %v682_v62  ;;  %v708_v13 = vadd.f32 %v706_v60, %v704_v37  ;;  %v1642_v31 = vmul.f32 %v1436_v2, %v1313_v40  ;;  %v1645_v14 = vadd.f32 %v1447_v3, %v803_v8 }
  0x68   : > { %v684_v41 = vsel %vm358_vm7, %v663_v43, %v683_v12  ;;  %v711_v15 = vrot.slane %v707_v24, 2  ;;  %v712_v44 = vrot.slane %v707_v24, 4  ;;  %v713_v16 = vrot.slane %v707_v24, 6 }
  0x69   : > { %v685_v17 = vsel %vm360_vm8, %v670_v10, %v684_v41  ;;  %v714_v18 = vrot.slane %v708_v13, 2  ;;  %v715_v21 = vrot.slane %v708_v13, 4  ;;  %v716_v22 = vrot.slane %v708_v13, 6 }
  0x6a   : > { %688 = vst.msk [vmem:[#allocation2 + $0x18] sm:$0xff] %vm363_vm9, %v685_v17  ;;  %v723_v27 = vsel %vm283_vm1, %v707_v24, 0.0  ;;  %v730_v28 = vsel %vm283_vm1, %v711_v15, 0.0  ;;  %v737_v29 = vsel %vm283_vm1, %v712_v44, 0.0  ;;  %v744_v30 = vsel %vm283_vm1, %v713_v16, 0.0 }
  0x6b   : > { %v724_v32 = vrot.slane %v723_v27, 4  ;;  %v731_v33 = vrot.slane %v730_v28, 4  ;;  %v738_v34 = vrot.slane %v737_v29, 4  ;;  %v745_v38 = vrot.slane %v744_v30, 4 }
  0x6c   : > { %v751_v42 = vsel %vm283_vm1, %v708_v13, 0.0  ;;  %v758_v46 = vsel %vm283_vm1, %v714_v18, 0.0  ;;  %v765_v47 = vsel %vm283_vm1, %v715_v21, 0.0  ;;  %v772_v48 = vsel %vm283_vm1, %v716_v22, 0.0 }
  0x6d   : > { %v725_v49 = vadd.f32 %v724_v32, %v723_v27  ;;  %v732_v50 = vadd.f32 %v731_v33, %v730_v28  ;;  %v739_v19 = vadd.f32 %v738_v34, %v737_v29  ;;  %v746_v51 = vadd.f32 %v745_v38, %v744_v30  ;;  %v1314_v27 = vld [vmem:[%s1442_s26 + $0xc0] sm:$0xff]  ;;  %v1315_v33 = vld [vmem:[%s1442_s26 + $0xc8] sm:$0xff]  ;;  %v1316_v34 = vld [vmem:[%s1442_s26 + $0xd0] sm:$0xff] }
  0x6e   : > { %v752_v52 = vrot.slane %v751_v42, 4  ;;  %v759_v53 = vrot.slane %v758_v46, 4  ;;  %v766_v54 = vrot.slane %v765_v47, 4  ;;  %v773_v55 = vrot.slane %v772_v48, 4 }
  0x6f   : > { %v726_v45 = vrot.slane %v725_v49, 2  ;;  %v733_v20 = vrot.slane %v732_v50, 2  ;;  %v740_v23 = vrot.slane %v739_v19, 2  ;;  %v747_v57 = vrot.slane %v746_v51, 2 }
  0x70   : > { %v753_v58 = vadd.f32 %v752_v52, %v751_v42  ;;  %v760_v59 = vadd.f32 %v759_v53, %v758_v46  ;;  %v767_v61 = vadd.f32 %v766_v54, %v765_v47  ;;  %v774_v36 = vadd.f32 %v773_v55, %v772_v48 }
  0x71   : > { %v1124_v39 = vld [vmem:[#allocation2 + $0x18] sm:$0xff]  ;;  %v727_v63 = vadd.f32 %v726_v45, %v725_v49  ;;  %v734_v0 = vadd.f32 %v733_v20, %v732_v50  ;;  %v741_v1 = vadd.f32 %v740_v23, %v739_v19  ;;  %v748_v25 = vadd.f32 %v747_v57, %v746_v51 }
  0x72   : > { %v1130_v35 = vpack.c.bf16 %v1124_v39, %v1123_v56  ;;  %v754_v37 = vrot.slane %v753_v58, 2  ;;  %v761_v26 = vrot.slane %v760_v59, 2  ;;  %v768_v43 = vrot.slane %v767_v61, 2 }
  0x73   : > { %v728_v4 = vrot.slane %v727_v63, 1  ;;  %v735_v5 = vrot.slane %v734_v0, 1  ;;  %v742_v6 = vrot.slane %v741_v1, 1  ;;  %v749_v40 = vrot.slane %v748_v25, 1 }
  0x74   : > { %1323 = vmatmul.msk.bf16.vlgmr.msra.gmra.mxu1 %vm363_vm9, %v1130_v35  ;;  %v755_v7 = vadd.f32 %v754_v37, %v753_v58  ;;  %v762_v60 = vadd.f32 %v761_v26, %v760_v59  ;;  %v769_v8 = vadd.f32 %v768_v43, %v767_v61  ;;  %v775_v10 = vrot.slane %v774_v36, 2 }
  0x75   : > { %v729_v62 = vadd.f32 %v728_v4, %v727_v63  ;;  %v736_v24 = vadd.f32 %v735_v5, %v734_v0  ;;  %v743_v12 = vadd.f32 %v742_v6, %v741_v1  ;;  %v750_v13 = vadd.f32 %v749_v40, %v748_v25 }
  0x76   : > { %v756_v41 = vrot.slane %v755_v7, 1  ;;  %v763_v15 = vrot.slane %v762_v60, 1  ;;  %v770_v44 = vrot.slane %v769_v8, 1  ;;  %v776_v16 = vadd.f32 %v775_v10, %v774_v36 }
  0x77   : > { %v787_v17 = vsel %vm348_vm2, %v736_v24, %v729_v62  ;;  %v808_v18 = vadd.f32 %v1447_v3, %v1634_v9  ;;  %v809_v21 = vadd.f32 %v1447_v3, %v1638_v11  ;;  %v810_v22 = vadd.f32 %v1447_v3, %v1642_v31  ;;  %v1317_v9 = vld [vmem:[%s1442_s26 + $0xd8] sm:$0xff] }
  0x78   : > { %v757_v28 = vadd.f32 %v756_v41, %v755_v7  ;;  %v764_v29 = vadd.f32 %v763_v15, %v762_v60  ;;  %v771_v30 = vadd.f32 %v770_v44, %v769_v8  ;;  %v777_v32 = vrot.slane %v776_v16, 1 }
  0x79   : > { %v788_v38 = vsel %vm350_vm3, %v743_v12, %v787_v17  ;;  %v811_v42 = vmax.f32 %v1645_v14, 0.0  ;;  %v812_v46 = vmax.f32 %v808_v18, 0.0  ;;  %v813_v47 = vmax.f32 %v809_v21, 0.0 }
  0x7a   : > { %v778_v48 = vadd.f32 %v777_v32, %v776_v16  ;;  %v789_v11 = vsel %vm352_vm4, %v750_v13, %v788_v38  ;;  %v814_v49 = vmax.f32 %v810_v22, 0.0  ;;  %v911_v31 = vmul.f32 %v1436_v2, %v1314_v27 }
  0x7b   : > { %v790_v50 = vsel %vm354_vm5, %v757_v28, %v789_v11  ;;  %v815_v19 = vadd.f32 %v813_v47, %v811_v42  ;;  %v1676_v51 = vmul.f32 %v1436_v2, %v1315_v33  ;;  %v1679_v52 = vmul.f32 %v1436_v2, %v1316_v34 }
  0x7c   : > { %v791_v14 = vsel %vm356_vm6, %v764_v29, %v790_v50  ;;  %v816_v53 = vadd.f32 %v814_v49, %v812_v46  ;;  %v1683_v54 = vmul.f32 %v1436_v2, %v1317_v9  ;;  %v1686_v55 = vadd.f32 %v1447_v3, %v911_v31 }
  0x7d   : > { %v792_v56 = vsel %vm358_vm7, %v771_v30, %v791_v14  ;;  %v819_v45 = vrot.slane %v815_v19, 2  ;;  %v820_v20 = vrot.slane %v815_v19, 4  ;;  %v821_v23 = vrot.slane %v815_v19, 6 }
  0x7e   : > { %v793_v57 = vsel %vm360_vm8, %v778_v48, %v792_v56  ;;  %v822_v58 = vrot.slane %v816_v53, 2  ;;  %v823_v59 = vrot.slane %v816_v53, 4  ;;  %v824_v61 = vrot.slane %v816_v53, 6 }
  0x7f   : > { %796 = vst.msk [vmem:[#allocation2 + $0x20] sm:$0xff] %vm363_vm9, %v793_v57  ;;  %v831_v36 = vsel %vm283_vm1, %v815_v19, 0.0  ;;  %v838_v2 = vsel %vm283_vm1, %v819_v45, 0.0  ;;  %v845_v39 = vsel %vm283_vm1, %v820_v20, 0.0  ;;  %v852_v3 = vsel %vm283_vm1, %v821_v23, 0.0 }
  0x80   : > { %v832_v63 = vrot.slane %v831_v36, 4  ;;  %v839_v0 = vrot.slane %v838_v2, 4  ;;  %v846_v1 = vrot.slane %v845_v39, 4  ;;  %v853_v25 = vrot.slane %v852_v3, 4  ;;  %v1703_v45 = vld [vmem:[%s1799_s2] ss:$0 sm:$0xff] }
  0x81   : > { %v859_v35 = vsel %vm283_vm1, %v816_v53, 0.0  ;;  %v866_v37 = vsel %vm283_vm1, %v822_v58, 0.0  ;;  %v873_v26 = vsel %vm283_vm1, %v823_v59, 0.0  ;;  %v880_v43 = vsel %vm283_vm1, %v824_v61, 0.0  ;;  %v1318_v58 = vld [vmem:[%s1442_s26 + $0xe0] sm:$0xff]  ;;  %v1319_v59 = vld [vmem:[%s1442_s26 + $0xe8] sm:$0xff] }
  0x82   : > { %v833_v4 = vadd.f32 %v832_v63, %v831_v36  ;;  %v840_v5 = vadd.f32 %v839_v0, %v838_v2  ;;  %v847_v6 = vadd.f32 %v846_v1, %v845_v39  ;;  %v854_v40 = vadd.f32 %v853_v25, %v852_v3  ;;  %v1320_v3 = vld [vmem:[%s1442_s26 + $0xf0] sm:$0xff]  ;;  %v1321_v63 = vld [vmem:[%s1442_s26 + $0xf8] sm:$0xff] }
  0x83   : > { %v860_v7 = vrot.slane %v859_v35, 4  ;;  %v867_v60 = vrot.slane %v866_v37, 4  ;;  %v874_v8 = vrot.slane %v873_v26, 4  ;;  %v881_v10 = vrot.slane %v880_v43, 4 }
  0x84   : > { %v834_v62 = vrot.slane %v833_v4, 2  ;;  %v841_v24 = vrot.slane %v840_v5, 2  ;;  %v848_v12 = vrot.slane %v847_v6, 2  ;;  %v855_v13 = vrot.slane %v854_v40, 2 }
  0x85   : > { %v861_v41 = vadd.f32 %v860_v7, %v859_v35  ;;  %v868_v15 = vadd.f32 %v867_v60, %v866_v37  ;;  %v875_v44 = vadd.f32 %v874_v8, %v873_v26  ;;  %v882_v16 = vadd.f32 %v881_v10, %v880_v43 }
  0x86   : > { %v835_v17 = vadd.f32 %v834_v62, %v833_v4  ;;  %v842_v18 = vadd.f32 %v841_v24, %v840_v5  ;;  %v849_v21 = vadd.f32 %v848_v12, %v847_v6  ;;  %v856_v22 = vadd.f32 %v855_v13, %v854_v40 }
  0x87   : > { %v862_v27 = vrot.slane %v861_v41, 2  ;;  %v869_v28 = vrot.slane %v868_v15, 2  ;;  %v876_v29 = vrot.slane %v875_v44, 2  ;;  %v883_v30 = vrot.slane %v882_v16, 2 }
  0x88   : > { %v836_v32 = vrot.slane %v835_v17, 1  ;;  %v843_v33 = vrot.slane %v842_v18, 1  ;;  %v850_v34 = vrot.slane %v849_v21, 1  ;;  %v857_v38 = vrot.slane %v856_v22, 1 }
  0x89   : > { %v863_v42 = vadd.f32 %v862_v27, %v861_v41  ;;  %v870_v46 = vadd.f32 %v869_v28, %v868_v15  ;;  %v877_v47 = vadd.f32 %v876_v29, %v875_v44  ;;  %v884_v9 = vadd.f32 %v883_v30, %v882_v16 }
  0x8a   : > { %v837_v48 = vadd.f32 %v836_v32, %v835_v17  ;;  %v844_v11 = vadd.f32 %v843_v33, %v842_v18  ;;  %v851_v49 = vadd.f32 %v850_v34, %v849_v21  ;;  %v858_v31 = vadd.f32 %v857_v38, %v856_v22 }
  0x8b   : > { %v864_v50 = vrot.slane %v863_v42, 1  ;;  %v871_v19 = vrot.slane %v870_v46, 1  ;;  %v878_v14 = vrot.slane %v877_v47, 1  ;;  %v885_v53 = vrot.slane %v884_v9, 1 }
  0x8c   : > { %v895_v56 = vsel %vm348_vm2, %v844_v11, %v837_v48  ;;  %v916_v20 = vadd.f32 %v1703_v45, %v1676_v51  ;;  %v917_v23 = vadd.f32 %v1703_v45, %v1679_v52  ;;  %v918_v57 = vadd.f32 %v1703_v45, %v1683_v54  ;;  %v1360_v54 = vld [vmem:[%s1798_s1] ss:$0 sm:$0xff] }
  0x8d   : > { %v865_v61 = vadd.f32 %v864_v50, %v863_v42  ;;  %v872_v36 = vadd.f32 %v871_v19, %v870_v46  ;;  %v879_v2 = vadd.f32 %v878_v14, %v877_v47  ;;  %v886_v39 = vadd.f32 %v885_v53, %v884_v9 }
  0x8e   : > { %v896_v0 = vsel %vm350_vm3, %v851_v49, %v895_v56  ;;  %v919_v1 = vmax.f32 %v1686_v55, 0.0  ;;  %v920_v25 = vmax.f32 %v916_v20, 0.0  ;;  %v921_v51 = vmax.f32 %v917_v23, 0.0  ;;  %v1125_v49 = vld [vmem:[#allocation2 + $0x20] sm:$0xff] }
  0x8f   : > { %v897_v35 = vsel %vm352_vm4, %v858_v31, %v896_v0  ;;  %v922_v52 = vmax.f32 %v918_v57, 0.0  ;;  %v1019_v37 = vmul.f32 %v1360_v54, %v1318_v58  ;;  %v1020_v26 = vmul.f32 %v1360_v54, %v1319_v59 }
  0x90   : > { %v898_v43 = vsel %vm354_vm5, %v865_v61, %v897_v35  ;;  %v923_v4 = vadd.f32 %v921_v51, %v919_v1  ;;  %v1722_v5 = vmul.f32 %v1360_v54, %v1320_v3  ;;  %v1724_v6 = vmul.f32 %v1360_v54, %v1321_v63 }
  0x91   : > { %v899_v55 = vsel %vm356_vm6, %v872_v36, %v898_v43  ;;  %v924_v40 = vadd.f32 %v922_v52, %v920_v25  ;;  %v1728_v7 = vadd.f32 %v1703_v45, %v1019_v37  ;;  %v1731_v60 = vadd.f32 %v1703_v45, %v1020_v26 }
  0x92   : > { %v900_v8 = vsel %vm358_vm7, %v879_v2, %v899_v55  ;;  %v927_v10 = vrot.slane %v923_v4, 2  ;;  %v928_v62 = vrot.slane %v923_v4, 4  ;;  %v929_v24 = vrot.slane %v923_v4, 6 }
  0x93   : > { %v901_v12 = vsel %vm360_vm8, %v886_v39, %v900_v8  ;;  %v930_v13 = vrot.slane %v924_v40, 2  ;;  %v931_v41 = vrot.slane %v924_v40, 4  ;;  %v932_v15 = vrot.slane %v924_v40, 6 }
  0x94   : > { %904 = vst.msk [vmem:[#allocation2 + $0x28] sm:$0xff] %vm363_vm9, %v901_v12  ;;  %v939_v44 = vsel %vm283_vm1, %v923_v4, 0.0  ;;  %v946_v16 = vsel %vm283_vm1, %v927_v10, 0.0  ;;  %v953_v17 = vsel %vm283_vm1, %v928_v62, 0.0  ;;  %v960_v18 = vsel %vm283_vm1, %v929_v24, 0.0 }
  0x95   : > { %v940_v21 = vrot.slane %v939_v44, 4  ;;  %v947_v22 = vrot.slane %v946_v16, 4  ;;  %v954_v27 = vrot.slane %v953_v17, 4  ;;  %v961_v28 = vrot.slane %v960_v18, 4 }
  0x96   : > { %v967_v29 = vsel %vm283_vm1, %v924_v40, 0.0  ;;  %v974_v30 = vsel %vm283_vm1, %v930_v13, 0.0  ;;  %v981_v32 = vsel %vm283_vm1, %v931_v41, 0.0  ;;  %v988_v33 = vsel %vm283_vm1, %v932_v15, 0.0 }
  0x97   : > { %v941_v34 = vadd.f32 %v940_v21, %v939_v44  ;;  %v948_v38 = vadd.f32 %v947_v22, %v946_v16  ;;  %v955_v42 = vadd.f32 %v954_v27, %v953_v17  ;;  %v962_v46 = vadd.f32 %v961_v28, %v960_v18 }
  0x98   : > { %v968_v47 = vrot.slane %v967_v29, 4  ;;  %v975_v9 = vrot.slane %v974_v30, 4  ;;  %v982_v48 = vrot.slane %v981_v32, 4  ;;  %v989_v11 = vrot.slane %v988_v33, 4 }
  0x99   : > { %v942_v31 = vrot.slane %v941_v34, 2  ;;  %v949_v50 = vrot.slane %v948_v38, 2  ;;  %v956_v19 = vrot.slane %v955_v42, 2  ;;  %v963_v14 = vrot.slane %v962_v46, 2 }
  0x9a   : > { %v969_v53 = vadd.f32 %v968_v47, %v967_v29  ;;  %v976_v56 = vadd.f32 %v975_v9, %v974_v30  ;;  %v983_v20 = vadd.f32 %v982_v48, %v981_v32  ;;  %v990_v23 = vadd.f32 %v989_v11, %v988_v33 }
  0x9b   : > { %v1126_v57 = vld [vmem:[#allocation2 + $0x28] sm:$0xff]  ;;  %v943_v58 = vadd.f32 %v942_v31, %v941_v34  ;;  %v950_v59 = vadd.f32 %v949_v50, %v948_v38  ;;  %v957_v61 = vadd.f32 %v956_v19, %v955_v42  ;;  %v964_v36 = vadd.f32 %v963_v14, %v962_v46 }
  0x9c   : > { %v1131_v2 = vpack.c.bf16 %v1126_v57, %v1125_v49  ;;  %v970_v39 = vrot.slane %v969_v53, 2  ;;  %v977_v3 = vrot.slane %v976_v56, 2  ;;  %v984_v63 = vrot.slane %v983_v20, 2 }
  0x9d   : > { %v944_v0 = vrot.slane %v943_v58, 1  ;;  %v951_v1 = vrot.slane %v950_v59, 1  ;;  %v958_v25 = vrot.slane %v957_v61, 1  ;;  %v965_v51 = vrot.slane %v964_v36, 1 }
  0x9e   : > { %1324 = vmatmul.msk.bf16.vlgmr.msra.gmra.mxu2 %vm363_vm9, %v1131_v2  ;;  %v971_v35 = vadd.f32 %v970_v39, %v969_v53  ;;  %v978_v52 = vadd.f32 %v977_v3, %v976_v56  ;;  %v985_v54 = vadd.f32 %v984_v63, %v983_v20  ;;  %v991_v37 = vrot.slane %v990_v23, 2 }
  0x9f   : > { %v945_v26 = vadd.f32 %v944_v0, %v943_v58  ;;  %v952_v43 = vadd.f32 %v951_v1, %v950_v59  ;;  %v959_v4 = vadd.f32 %v958_v25, %v957_v61  ;;  %v966_v55 = vadd.f32 %v965_v51, %v964_v36 }
  0xa0   : > { %v972_v40 = vrot.slane %v971_v35, 1  ;;  %v979_v8 = vrot.slane %v978_v52, 1  ;;  %v986_v10 = vrot.slane %v985_v54, 1  ;;  %v992_v62 = vadd.f32 %v991_v37, %v990_v23 }
  0xa1   : > { %v1003_v24 = vsel %vm348_vm2, %v952_v43, %v945_v26  ;;  %v1025_v12 = vadd.f32 %v1703_v45, %v1722_v5  ;;  %v1026_v13 = vadd.f32 %v1703_v45, %v1724_v6  ;;  %v1027_v41 = vmax.f32 %v1728_v7, 0.0 }
  0xa2   : > { %v973_v15 = vadd.f32 %v972_v40, %v971_v35  ;;  %v980_v44 = vadd.f32 %v979_v8, %v978_v52  ;;  %v987_v16 = vadd.f32 %v986_v10, %v985_v54  ;;  %v993_v17 = vrot.slane %v992_v62, 1 }
  0xa3   : > { %v1004_v18 = vsel %vm350_vm3, %v959_v4, %v1003_v24  ;;  %v1028_v21 = vmax.f32 %v1731_v60, 0.0  ;;  %v1029_v22 = vmax.f32 %v1025_v12, 0.0  ;;  %v1030_v27 = vmax.f32 %v1026_v13, 0.0 }
  0xa4   : > { %v994_v28 = vadd.f32 %v993_v17, %v992_v62  ;;  %v1005_v29 = vsel %vm352_vm4, %v966_v55, %v1004_v18 }
  0xa5   : > { %v1006_v5 = vsel %vm354_vm5, %v973_v15, %v1005_v29  ;;  %v1031_v30 = vadd.f32 %v1029_v22, %v1027_v41  ;;  %v1032_v32 = vadd.f32 %v1030_v27, %v1028_v21 }
  0xa6   : > { %v1007_v45 = vsel %vm356_vm6, %v980_v44, %v1006_v5 }
  0xa7   : > { %v1008_v6 = vsel %vm358_vm7, %v987_v16, %v1007_v45  ;;  %v1035_v7 = vrot.slane %v1031_v30, 2  ;;  %v1036_v33 = vrot.slane %v1031_v30, 4  ;;  %v1037_v34 = vrot.slane %v1031_v30, 6 }
  0xa8   : > { %v1009_v38 = vsel %vm360_vm8, %v994_v28, %v1008_v6  ;;  %v1038_v42 = vrot.slane %v1032_v32, 2  ;;  %v1039_v60 = vrot.slane %v1032_v32, 4  ;;  %v1040_v46 = vrot.slane %v1032_v32, 6 }
  0xa9   : > { %1012 = vst.msk [vmem:[#allocation2 + $0x30] sm:$0xff] %vm363_vm9, %v1009_v38  ;;  %v1047_v47 = vsel %vm283_vm1, %v1031_v30, 0.0  ;;  %v1054_v9 = vsel %vm283_vm1, %v1035_v7, 0.0  ;;  %v1061_v48 = vsel %vm283_vm1, %v1036_v33, 0.0  ;;  %v1068_v11 = vsel %vm283_vm1, %v1037_v34, 0.0 }
  0xaa   : > { %v1048_v49 = vrot.slane %v1047_v47, 4  ;;  %v1055_v31 = vrot.slane %v1054_v9, 4  ;;  %v1062_v50 = vrot.slane %v1061_v48, 4  ;;  %v1069_v19 = vrot.slane %v1068_v11, 4 }
  0xab   : > { %v1075_v14 = vsel %vm283_vm1, %v1032_v32, 0.0  ;;  %v1082_v53 = vsel %vm283_vm1, %v1038_v42, 0.0  ;;  %v1089_v56 = vsel %vm283_vm1, %v1039_v60, 0.0  ;;  %v1096_v20 = vsel %vm283_vm1, %v1040_v46, 0.0 }
  0xac   : > { %v1049_v23 = vadd.f32 %v1048_v49, %v1047_v47  ;;  %v1056_v57 = vadd.f32 %v1055_v31, %v1054_v9  ;;  %v1063_v58 = vadd.f32 %v1062_v50, %v1061_v48  ;;  %v1070_v59 = vadd.f32 %v1069_v19, %v1068_v11 }
  0xad   : > { %v1076_v61 = vrot.slane %v1075_v14, 4  ;;  %v1083_v36 = vrot.slane %v1082_v53, 4  ;;  %v1090_v2 = vrot.slane %v1089_v56, 4  ;;  %v1097_v39 = vrot.slane %v1096_v20, 4 }
  0xae   : > { %v1050_v3 = vrot.slane %v1049_v23, 2  ;;  %v1057_v63 = vrot.slane %v1056_v57, 2  ;;  %v1064_v0 = vrot.slane %v1063_v58, 2  ;;  %v1071_v1 = vrot.slane %v1070_v59, 2 }
  0xaf   : > { %v1077_v25 = vadd.f32 %v1076_v61, %v1075_v14  ;;  %v1084_v51 = vadd.f32 %v1083_v36, %v1082_v53  ;;  %v1091_v35 = vadd.f32 %v1090_v2, %v1089_v56  ;;  %v1098_v52 = vadd.f32 %v1097_v39, %v1096_v20 }
  0xb0   : > { %v1051_v54 = vadd.f32 %v1050_v3, %v1049_v23  ;;  %v1058_v37 = vadd.f32 %v1057_v63, %v1056_v57  ;;  %v1065_v26 = vadd.f32 %v1064_v0, %v1063_v58  ;;  %v1072_v43 = vadd.f32 %v1071_v1, %v1070_v59  ;;  %v1127_v46 = vld [vmem:[#allocation2 + $0x30] sm:$0xff] }
  0xb1   : > { %v1078_v4 = vrot.slane %v1077_v25, 2  ;;  %v1085_v55 = vrot.slane %v1084_v51, 2  ;;  %v1092_v40 = vrot.slane %v1091_v35, 2  ;;  %v1099_v8 = vrot.slane %v1098_v52, 2 }
  0xb2   : > { %v1052_v10 = vrot.slane %v1051_v54, 1  ;;  %v1059_v62 = vrot.slane %v1058_v37, 1  ;;  %v1066_v24 = vrot.slane %v1065_v26, 1  ;;  %v1073_v12 = vrot.slane %v1072_v43, 1 }
  0xb3   : > { %v1079_v13 = vadd.f32 %v1078_v4, %v1077_v25  ;;  %v1086_v41 = vadd.f32 %v1085_v55, %v1084_v51  ;;  %v1093_v15 = vadd.f32 %v1092_v40, %v1091_v35  ;;  %v1100_v44 = vadd.f32 %v1099_v8, %v1098_v52 }
  0xb4   : > { %v1053_v16 = vadd.f32 %v1052_v10, %v1051_v54  ;;  %v1060_v17 = vadd.f32 %v1059_v62, %v1058_v37  ;;  %v1067_v18 = vadd.f32 %v1066_v24, %v1065_v26  ;;  %v1074_v21 = vadd.f32 %v1073_v12, %v1072_v43 }
  0xb5   : > { %v1080_v22 = vrot.slane %v1079_v13, 1  ;;  %v1087_v27 = vrot.slane %v1086_v41, 1  ;;  %v1094_v28 = vrot.slane %v1093_v15, 1  ;;  %v1101_v29 = vrot.slane %v1100_v44, 1 }
  0xb6   : > { %v1111_v5 = vsel %vm348_vm2, %v1060_v17, %v1053_v16 }
  0xb7   : > { %v1081_v30 = vadd.f32 %v1080_v22, %v1079_v13  ;;  %v1088_v32 = vadd.f32 %v1087_v27, %v1086_v41  ;;  %v1095_v45 = vadd.f32 %v1094_v28, %v1093_v15  ;;  %v1112_v6 = vsel %vm350_vm3, %v1067_v18, %v1111_v5 }
  0xb8   : > { %v1102_v7 = vadd.f32 %v1101_v29, %v1100_v44  ;;  %v1113_v33 = vsel %vm352_vm4, %v1074_v21, %v1112_v6 }
  0xb9   : > { %v1114_v34 = vsel %vm354_vm5, %v1081_v30, %v1113_v33 }
  0xba   : > { %v1115_v38 = vsel %vm356_vm6, %v1088_v32, %v1114_v34 }
  0xbb   : > { %v1116_v42 = vsel %vm358_vm7, %v1095_v45, %v1115_v38 }
  0xbc   : > { %v1117_v60 = vsel %vm360_vm8, %v1102_v7, %v1116_v42 }
  0xbd   : > { %1120 = vst.msk [vmem:[#allocation2 + $0x38] sm:$0xff] %vm363_vm9, %v1117_v60 }
  0xc4   : > { %v1128_v47 = vld [vmem:[#allocation2 + $0x38] sm:$0xff] }
  0xc5   : > { %v1132_v9 = vpack.c.bf16 %v1128_v47, %v1127_v46 }
  0xc6   : > { %v1159_v48 = vpop.f32.mrf.mxu0 }
  0xc7   : > { %1180 = vst.msk [vmem:[%s238_s10] sm:$0xff] %vm1179_vm10, %v1159_v48  ;;  %1325 = vmatmul.msk.bf16.vlgmr.msra.gmra.mxu3 %vm363_vm9, %v1132_v9 }
  0xce   : > { %v1161_v31 = vpop.f32.mrf.mxu0 }
  0xcf   : > { %1181 = vst.msk [vmem:[%s238_s10 + $0x8] sm:$0xff] %vm1179_vm10, %v1161_v31 }
  0xf1   : > { %v1164_v11 = vpop.f32.mrf.mxu1 }
  0xf2   : > { %1182 = vst.msk [vmem:[%s238_s10 + $0x10] sm:$0xff] %vm1179_vm10, %v1164_v11 }
  0xf9   : > { %v1166_v50 = vpop.f32.mrf.mxu1 }
  0xfa   : > { %1183 = vst.msk [vmem:[%s238_s10 + $0x18] sm:$0xff] %vm1179_vm10, %v1166_v50 }
 0x121   : > { %v1169_v49 = vpop.f32.mrf.mxu2 }
 0x122   : > { %1184 = vst.msk [vmem:[%s238_s10 + $0x20] sm:$0xff] %vm1179_vm10, %v1169_v49 }
 0x129   : > { %v1171_v19 = vpop.f32.mrf.mxu2 }
 0x12a   : > { %1185 = vst.msk [vmem:[%s238_s10 + $0x28] sm:$0xff] %vm1179_vm10, %v1171_v19 }
 0x14a   : > { %v1174_v14 = vpop.f32.mrf.mxu3 }
 0x14b   : > { %1186 = vst.msk [vmem:[%s238_s10 + $0x30] sm:$0xff] %vm1179_vm10, %v1174_v14 }
 0x152   : > { %v1176_v53 = vpop.f32.mrf.mxu3 }
 0x153   : > { %1187 = vst.msk [vmem:[%s238_s10 + $0x38] sm:$0xff] %vm1179_vm10, %v1176_v53 }
 0x154 PF: > { %s14_s17 = sadd.s32 1, %s1383_s17   ;;  %s1802_s15 = smov %s1379_s16 }
 0x155   : > { %p11_p5 = scmp.ge.s32.totalorder %s14_s17, 4   ;;  %s1803_s16 = smov %s1805_s18 }
 0x157   :  { %13 = sbr.rel (!%p11_p5) target bundleno = 2 (0x2), region = 81 }

</bundles_post_ra>
